<compile_context>
chip_gen: v5e
topology: v5e:2x2
jax: 0.10.0
libtpu: 0.0.40
codegen_flags: <defaults>
</compile_context>

<pallas_src>
import functools

import jax
import jax.numpy as jnp
from jax.experimental import pallas as pl
from jax.experimental.pallas import tpu as pltpu

_SUBLANE = 8  # f32 sublane granule (second-to-last block dim)


def _round_up(x: int, m: int) -> int:
    return ((x + m - 1) // m) * m


def _default_lane_align() -> int:
    """256 on v6e/v7x (2x256x256 MXU), 128 on v5e and older (128x128 MXU)."""
    try:
        kind = jax.devices()[0].device_kind.lower()
    except Exception:
        return 128
    for tag in ("v2", "v3", "v4", "v5"):
        if tag in kind:
            return 128
    return 256


def _physical_vmem_bytes():
    try:
        return int(pltpu.get_tpu_info().vmem_capacity_bytes)
    except Exception:
        return None


def _mlp_kernel(n_linear: int, act_dtype, *refs):
    """refs = [x_ref, w0, b0, ..., w_{n-1}, b_{n-1}, out_ref].

    Layers 0..n-2 are Linear+ReLU, the last is a plain Linear (RNDNetwork).
    Per layer: f32 MXU accumulation, f32 bias-add/ReLU, single down-cast to
    act_dtype (bf16 fast path) for the next layer's matmul input.
    """
    x_ref = refs[0]
    out_ref = refs[-1]
    wb = refs[1:-1]

    h = x_ref[...]                                         # (TM, in_pad), act_dtype
    for i in range(n_linear):
        w = wb[2 * i][...]                                 # (in_pad, out_pad)
        b = wb[2 * i + 1][...]                             # (1, out_pad), f32
        acc = jnp.dot(h.astype(w.dtype), w, preferred_element_type=jnp.float32) + b
        if i < n_linear - 1:
            acc = jnp.maximum(acc, 0.0)
            h = acc.astype(act_dtype)                      # single cast per layer
        else:
            h = acc                                        # final layer stays f32
    out_ref[...] = h.astype(out_ref.dtype)


def prepare_rnd_params(weights, biases, *, param_dtype=jnp.bfloat16, lane_align=None):
    """One-time pad + dtype-cast of RNDNetwork parameters. Reuse across calls.

    weights[i]: (in_i, out_i) — pre-transposed vs PyTorch nn.Linear's (out, in).
    biases[i]:  (out_i,) or (1, out_i).
    Padded rows/cols/bias lanes are zero, so padded columns propagate exact zeros.
    """
    if lane_align is None:
        lane_align = _default_lane_align()
    param_dtype = jnp.dtype(param_dtype)

    n_linear = len(weights)
    in_dims = [int(w.shape[0]) for w in weights]
    out_dims = [int(w.shape[1]) for w in weights]
    in_pad = [_round_up(d, lane_align) for d in in_dims]
    out_pad = [_round_up(d, lane_align) for d in out_dims]

    params = []
    for li, (w, b) in enumerate(zip(weights, biases)):
        w = jnp.asarray(w, jnp.float32)
        b2 = jnp.asarray(b, jnp.float32).reshape(1, -1)
        if w.shape != (in_pad[li], out_pad[li]):
            w = (jnp.zeros((in_pad[li], out_pad[li]), jnp.float32)
                 .at[: in_dims[li], : out_dims[li]].set(w))
        if b2.shape[1] != out_pad[li]:
            b2 = jnp.zeros((1, out_pad[li]), jnp.float32).at[:, : out_dims[li]].set(b2)
        params.append(w.astype(param_dtype))   # weights in param_dtype (bf16 fast path)
        params.append(b2)                       # bias stays f32 (added to f32 accumulator)

    return dict(
        params=tuple(params),
        n_linear=n_linear,
        input_size=in_dims[0],
        hidden_size=out_dims[-1],
        in_pad=tuple(in_pad),
        out_pad=tuple(out_pad),
        param_dtype=param_dtype,
        lane_align=lane_align,
    )


def rnd_network_forward(
    x,
    prepared,
    *,
    block_m: int = 256,
    out_dtype=jnp.float32,
    single_buffer_params: bool = True,
    vmem_limit_bytes=None,
):
    """Forward pass of RNDNetwork. `prepared` = prepare_rnd_params(...) output."""
    batch, input_size = x.shape
    assert input_size == prepared["input_size"], (input_size, prepared["input_size"])

    params = prepared["params"]
    n_linear = prepared["n_linear"]
    in_pad0 = prepared["in_pad"][0]
    out_feat = prepared["out_pad"][-1]
    hidden_size = prepared["hidden_size"]
    param_dtype = prepared["param_dtype"]
    out_dtype = jnp.dtype(out_dtype)

    # Stream activations in the param dtype (bf16 halves activation DMA + the x
    # double-buffer); f32-param path keeps f32 activations.
    act_dtype = param_dtype if param_dtype == jnp.dtype(jnp.bfloat16) else jnp.dtype(jnp.float32)

    # Batch tile: sublane-granule 8; >= 2 grid steps when the batch allows so both
    # v7x TensorCores get work; default 256 keeps v5e's single vst slot off the
    # critical path and is 256-aligned for the v6e/v7x MXU.
    tm = max(_SUBLANE, min(_round_up(block_m, _SUBLANE),
                           _round_up(pl.cdiv(batch, 2), _SUBLANE)))
    padded_batch = _round_up(batch, tm)
    n_tiles = padded_batch // tm

    # Pad/cast x only when it is not already in the right shape/dtype.
    if (padded_batch, in_pad0) == (batch, input_size) and x.dtype == act_dtype:
        x_p = x
    else:
        x_p = (jnp.zeros((padded_batch, in_pad0), act_dtype)
               .at[:batch, :input_size].set(x.astype(act_dtype)))

    # VMEM budget: resident params (x buffer_count) + streamed x/out double buffers
    # + f32 layer intermediates, with headroom; capped below physical VMEM.
    param_bytes = sum(int(p.size) * p.dtype.itemsize for p in params)
    act_tile_bytes = tm * in_pad0 * act_dtype.itemsize
    out_tile_bytes = tm * out_feat * out_dtype.itemsize
    inter_bytes = 2 * 4 * tm * max(prepared["out_pad"])
    phys = _physical_vmem_bytes()
    cap = (phys * 3) // 4 if phys else 48 * 1024 * 1024

    def _vmem_limit(param_buffer_count):
        if vmem_limit_bytes is not None:
            return vmem_limit_bytes
        need = int(1.25 * (param_buffer_count * param_bytes
                           + 2 * (act_tile_bytes + out_tile_bytes)
                           + inter_bytes)) + (2 << 20)
        if need <= 32 * 1024 * 1024:
            return None                      # default scoped limit is enough
        return min(need, cap)

    flops = 2 * padded_batch * sum(ip * op for ip, op in
                                   zip(prepared["in_pad"], prepared["out_pad"]))
    bytes_accessed = (int(x_p.size) * x_p.dtype.itemsize
                      + param_bytes
                      + padded_batch * out_feat * out_dtype.itemsize)
    cost = pl.CostEstimate(flops=flops, transcendentals=0, bytes_accessed=bytes_accessed)

    kernel = functools.partial(_mlp_kernel, n_linear, act_dtype)

    def _call(param_buffer_count):
        in_specs = [pl.BlockSpec((tm, in_pad0), lambda i: (i, 0))]
        for p in params:
            if param_buffer_count == 1:
                # Constant index_map (0,0): params are grid-invariant, single buffer.
                spec = pl.BlockSpec(p.shape, lambda i: (0, 0),
                                    pipeline_mode=pl.Buffered(1))
            else:
                spec = pl.BlockSpec(p.shape, lambda i: (0, 0))
            in_specs.append(spec)
        out_spec = pl.BlockSpec((tm, out_feat), lambda i: (i, 0))
        return pl.pallas_call(
            kernel,
            out_shape=jax.ShapeDtypeStruct((padded_batch, out_feat), out_dtype),
            grid=(n_tiles,),
            in_specs=in_specs,
            out_specs=out_spec,
            compiler_params=pltpu.CompilerParams(
                dimension_semantics=("parallel",),   # shard batch tiles across TCs (v7x)
                vmem_limit_bytes=_vmem_limit(param_buffer_count),
            ),
            cost_estimate=cost,
        )(x_p, *params)

    if single_buffer_params:
        try:
            out_padded = _call(1)
        except Exception:
            # Fallback: default double-buffered params (always supported).
            out_padded = _call(2)
    else:
        out_padded = _call(2)

    if (padded_batch, out_feat) == (batch, hidden_size):
        return out_padded
    return out_padded[:batch, :hidden_size]


def init_rnd_params(key, input_size: int, hidden_size: int, n_layers: int):
    """Deterministic init mimicking PyTorch Linear defaults (U(-1/sqrt(fan_in), +))."""
    weights, biases = [], []
    sizes = [(input_size if i == 0 else hidden_size, hidden_size) for i in range(n_layers + 1)]
    for fan_in, fan_out in sizes:
        key, kw, kb = jax.random.split(key, 3)
        bound = 1.0 / jnp.sqrt(jnp.float32(fan_in))
        # Stored as (in, out) == transpose of PyTorch's (out, in).
        w = jax.random.uniform(kw, (fan_in, fan_out), jnp.float32, -bound, bound)
        b = jax.random.uniform(kb, (1, fan_out), jnp.float32, -bound, bound)
        weights.append(w)
        biases.append(b)
    return weights, biases


def rnd_network_ref(x, weights, biases, param_dtype=jnp.float32):
    """Pure-JAX reference following the same precision path as the kernel."""
    param_dtype = jnp.dtype(param_dtype)
    act_dtype = param_dtype if param_dtype == jnp.dtype(jnp.bfloat16) else jnp.dtype(jnp.float32)
    h = x.astype(act_dtype)
    n_linear = len(weights)
    for i, (w, b) in enumerate(zip(weights, biases)):
        w_c = jnp.asarray(w, jnp.float32).astype(param_dtype)
        acc = jnp.dot(h.astype(param_dtype), w_c, preferred_element_type=jnp.float32)
        acc = acc + jnp.asarray(b, jnp.float32).reshape(1, -1)
        if i < n_linear - 1:
            acc = jnp.maximum(acc, 0.0)
            h = acc.astype(act_dtype)
        else:
            h = acc
    return h


if __name__ == "__main__":
    input_size = 16
    hidden_size = 32
    n_layers = 2
    batch = 8

    key = jax.random.PRNGKey(0)
    key, kx = jax.random.split(key)
    x = jax.random.normal(kx, (batch, input_size), jnp.float32)

    weights, biases = init_rnd_params(key, input_size, hidden_size, n_layers)

    # Fast path: one-time prepared (padded, bf16) params; bf16 activation streaming.
    prepared_bf16 = prepare_rnd_params(weights, biases, param_dtype=jnp.bfloat16)
    out_bf16 = jax.block_until_ready(rnd_network_forward(x, prepared_bf16))
    ref_bf16 = rnd_network_ref(x, weights, biases, param_dtype=jnp.bfloat16)
    assert out_bf16.shape == (batch, hidden_size), out_bf16.shape
    assert jnp.allclose(out_bf16, ref_bf16, atol=2e-2, rtol=2e-2), "bf16 path mismatch"

    # f32-param path (closest to PyTorch f32 forward; MXU still uses bf16 passes,
    # so it is numerically close but not bit-identical to a CPU f32 GEMM).
    prepared_f32 = prepare_rnd_params(weights, biases, param_dtype=jnp.float32)
    out_f32 = jax.block_until_ready(rnd_network_forward(x, prepared_f32))
    ref_f32 = rnd_network_ref(x, weights, biases, param_dtype=jnp.float32)
    assert jnp.allclose(out_f32, ref_f32, atol=1e-4, rtol=1e-4), "f32 path mismatch"

    print("KERNEL_OK")
</pallas_src>

<mosaic_0001>
module attributes {stable_mosaic.version = 11 : i64} {
  func.func @_mlp_kernel(%arg0: i32, %arg1: memref<8x256xbf16, #tpu.memory_space<vmem>>, %arg2: memref<256x256xbf16, #tpu.memory_space<vmem>>, %arg3: memref<1x256xf32, #tpu.memory_space<vmem>>, %arg4: memref<256x256xbf16, #tpu.memory_space<vmem>>, %arg5: memref<1x256xf32, #tpu.memory_space<vmem>>, %arg6: memref<256x256xbf16, #tpu.memory_space<vmem>>, %arg7: memref<1x256xf32, #tpu.memory_space<vmem>>, %arg8: memref<8x256xf32, #tpu.memory_space<vmem>>) attributes {dimension_semantics = [#tpu.dimension_semantics<parallel>], iteration_bounds = array<i64: 1>, scalar_prefetch = 0 : i64, scratch_operands = 0 : i64, tpu.core_type = #tpu.core_type<tc>, window_params = [{transform_indices = @transform_0, window_bounds = array<i64: 8, 256>}, {pipeline_mode = #tpu.pipeline_mode<synchronous>, transform_indices = @transform_1, window_bounds = array<i64: 256, 256>}, {pipeline_mode = #tpu.pipeline_mode<synchronous>, transform_indices = @transform_2, window_bounds = array<i64: 1, 256>}, {pipeline_mode = #tpu.pipeline_mode<synchronous>, transform_indices = @transform_3, window_bounds = array<i64: 256, 256>}, {pipeline_mode = #tpu.pipeline_mode<synchronous>, transform_indices = @transform_4, window_bounds = array<i64: 1, 256>}, {pipeline_mode = #tpu.pipeline_mode<synchronous>, transform_indices = @transform_5, window_bounds = array<i64: 256, 256>}, {pipeline_mode = #tpu.pipeline_mode<synchronous>, transform_indices = @transform_6, window_bounds = array<i64: 1, 256>}, {transform_indices = @transform_7, window_bounds = array<i64: 8, 256>}]} {
    %c0 = arith.constant 0 : index
    %c0_0 = arith.constant 0 : index
    %0 = vector.load %arg1[%c0, %c0_0] : memref<8x256xbf16, #tpu.memory_space<vmem>>, vector<8x256xbf16>
    %c0_1 = arith.constant 0 : index
    %c0_2 = arith.constant 0 : index
    %1 = vector.load %arg2[%c0_1, %c0_2] : memref<256x256xbf16, #tpu.memory_space<vmem>>, vector<256x256xbf16>
    %c0_3 = arith.constant 0 : index
    %c0_4 = arith.constant 0 : index
    %2 = vector.load %arg3[%c0_3, %c0_4] : memref<1x256xf32, #tpu.memory_space<vmem>>, vector<1x256xf32>
    %cst = arith.constant dense<0.000000e+00> : vector<8x256xf32>
    %3 = tpu.matmul %0, %1, %cst {dimension_numbers = #tpu.dot_dimension_numbers<[1], [0], [0], [1], [0, 0, 1, 1], [], []>} : vector<8x256xbf16>, vector<256x256xbf16>, vector<8x256xf32> -> vector<8x256xf32>
    %4 = vector.broadcast %2 : vector<1x256xf32> to vector<8x256xf32>
    %5 = arith.addf %3, %4 : vector<8x256xf32>
    %cst_5 = arith.constant 0.000000e+00 : f32
    %6 = vector.broadcast %cst_5 : f32 to vector<8x256xf32>
    %7 = arith.maximumf %5, %6 : vector<8x256xf32>
    %8 = arith.truncf %7 : vector<8x256xf32> to vector<8x256xbf16>
    %c0_6 = arith.constant 0 : index
    %c0_7 = arith.constant 0 : index
    %9 = vector.load %arg4[%c0_6, %c0_7] : memref<256x256xbf16, #tpu.memory_space<vmem>>, vector<256x256xbf16>
    %c0_8 = arith.constant 0 : index
    %c0_9 = arith.constant 0 : index
    %10 = vector.load %arg5[%c0_8, %c0_9] : memref<1x256xf32, #tpu.memory_space<vmem>>, vector<1x256xf32>
    %cst_10 = arith.constant dense<0.000000e+00> : vector<8x256xf32>
    %11 = tpu.matmul %8, %9, %cst_10 {dimension_numbers = #tpu.dot_dimension_numbers<[1], [0], [0], [1], [0, 0, 1, 1], [], []>} : vector<8x256xbf16>, vector<256x256xbf16>, vector<8x256xf32> -> vector<8x256xf32>
    %12 = vector.broadcast %10 : vector<1x256xf32> to vector<8x256xf32>
    %13 = arith.addf %11, %12 : vector<8x256xf32>
    %cst_11 = arith.constant 0.000000e+00 : f32
    %14 = vector.broadcast %cst_11 : f32 to vector<8x256xf32>
    %15 = arith.maximumf %13, %14 : vector<8x256xf32>
    %16 = arith.truncf %15 : vector<8x256xf32> to vector<8x256xbf16>
    %c0_12 = arith.constant 0 : index
    %c0_13 = arith.constant 0 : index
    %17 = vector.load %arg6[%c0_12, %c0_13] : memref<256x256xbf16, #tpu.memory_space<vmem>>, vector<256x256xbf16>
    %c0_14 = arith.constant 0 : index
    %c0_15 = arith.constant 0 : index
    %18 = vector.load %arg7[%c0_14, %c0_15] : memref<1x256xf32, #tpu.memory_space<vmem>>, vector<1x256xf32>
    %cst_16 = arith.constant dense<0.000000e+00> : vector<8x256xf32>
    %19 = tpu.matmul %16, %17, %cst_16 {dimension_numbers = #tpu.dot_dimension_numbers<[1], [0], [0], [1], [0, 0, 1, 1], [], []>} : vector<8x256xbf16>, vector<256x256xbf16>, vector<8x256xf32> -> vector<8x256xf32>
    %20 = vector.broadcast %18 : vector<1x256xf32> to vector<8x256xf32>
    %21 = arith.addf %19, %20 : vector<8x256xf32>
    %c0_17 = arith.constant 0 : index
    %c0_18 = arith.constant 0 : index
    %22 = vector.load %arg8[%c0_17, %c0_18] : memref<8x256xf32, #tpu.memory_space<vmem>>, vector<8x256xf32>
    tpu.vector_store %arg8[%c0_17, %c0_18], %21 {strides = array<i32>} : memref<8x256xf32, #tpu.memory_space<vmem>>, vector<8x256xf32>,
    return
  }
  func.func @transform_0(%arg0: i32) -> (i32, i32) {
    %c0_i32 = arith.constant 0 : i32
    %c0_i32_0 = arith.constant 0 : i32
    return %arg0, %c0_i32 : i32, i32
  }
  func.func @transform_1(%arg0: i32) -> (i32, i32) {
    %c0_i32 = arith.constant 0 : i32
    %c0_i32_0 = arith.constant 0 : i32
    %c0_i32_1 = arith.constant 0 : i32
    return %c0_i32, %c0_i32_0 : i32, i32
  }
  func.func @transform_2(%arg0: i32) -> (i32, i32) {
    %c0_i32 = arith.constant 0 : i32
    %c0_i32_0 = arith.constant 0 : i32
    %c0_i32_1 = arith.constant 0 : i32
    return %c0_i32, %c0_i32_0 : i32, i32
  }
  func.func @transform_3(%arg0: i32) -> (i32, i32) {
    %c0_i32 = arith.constant 0 : i32
    %c0_i32_0 = arith.constant 0 : i32
    %c0_i32_1 = arith.constant 0 : i32
    return %c0_i32, %c0_i32_0 : i32, i32
  }
  func.func @transform_4(%arg0: i32) -> (i32, i32) {
    %c0_i32 = arith.constant 0 : i32
    %c0_i32_0 = arith.constant 0 : i32
    %c0_i32_1 = arith.constant 0 : i32
    return %c0_i32, %c0_i32_0 : i32, i32
  }
  func.func @transform_5(%arg0: i32) -> (i32, i32) {
    %c0_i32 = arith.constant 0 : i32
    %c0_i32_0 = arith.constant 0 : i32
    %c0_i32_1 = arith.constant 0 : i32
    return %c0_i32, %c0_i32_0 : i32, i32
  }
  func.func @transform_6(%arg0: i32) -> (i32, i32) {
    %c0_i32 = arith.constant 0 : i32
    %c0_i32_0 = arith.constant 0 : i32
    %c0_i32_1 = arith.constant 0 : i32
    return %c0_i32, %c0_i32_0 : i32, i32
  }
  func.func @transform_7(%arg0: i32) -> (i32, i32) {
    %c0_i32 = arith.constant 0 : i32
    %c0_i32_0 = arith.constant 0 : i32
    return %arg0, %c0_i32 : i32, i32
  }
}

module attributes {stable_mosaic.version = 11 : i64} {
  func.func @_mlp_kernel(%arg0: i32, %arg1: memref<8x256xbf16, #tpu.memory_space<vmem>>, %arg2: memref<256x256xbf16, #tpu.memory_space<vmem>>, %arg3: memref<1x256xf32, #tpu.memory_space<vmem>>, %arg4: memref<256x256xbf16, #tpu.memory_space<vmem>>, %arg5: memref<1x256xf32, #tpu.memory_space<vmem>>, %arg6: memref<256x256xbf16, #tpu.memory_space<vmem>>, %arg7: memref<1x256xf32, #tpu.memory_space<vmem>>, %arg8: memref<8x256xf32, #tpu.memory_space<vmem>>) attributes {dimension_semantics = [#tpu.dimension_semantics<parallel>], iteration_bounds = array<i64: 1>, scalar_prefetch = 0 : i64, scratch_operands = 0 : i64, tpu.core_type = #tpu.core_type<tc>, window_params = [{transform_indices = @transform_0, window_bounds = array<i64: 8, 256>}, {pipeline_mode = #tpu.pipeline_mode<synchronous>, transform_indices = @transform_1, window_bounds = array<i64: 256, 256>}, {pipeline_mode = #tpu.pipeline_mode<synchronous>, transform_indices = @transform_2, window_bounds = array<i64: 1, 256>}, {pipeline_mode = #tpu.pipeline_mode<synchronous>, transform_indices = @transform_3, window_bounds = array<i64: 256, 256>}, {pipeline_mode = #tpu.pipeline_mode<synchronous>, transform_indices = @transform_4, window_bounds = array<i64: 1, 256>}, {pipeline_mode = #tpu.pipeline_mode<synchronous>, transform_indices = @transform_5, window_bounds = array<i64: 256, 256>}, {pipeline_mode = #tpu.pipeline_mode<synchronous>, transform_indices = @transform_6, window_bounds = array<i64: 1, 256>}, {transform_indices = @transform_7, window_bounds = array<i64: 8, 256>}]} {
    %c0 = arith.constant 0 : index
    %c0_0 = arith.constant 0 : index
    %0 = vector.load %arg1[%c0, %c0_0] : memref<8x256xbf16, #tpu.memory_space<vmem>>, vector<8x256xbf16>
    %c0_1 = arith.constant 0 : index
    %c0_2 = arith.constant 0 : index
    %1 = vector.load %arg2[%c0_1, %c0_2] : memref<256x256xbf16, #tpu.memory_space<vmem>>, vector<256x256xbf16>
    %c0_3 = arith.constant 0 : index
    %c0_4 = arith.constant 0 : index
    %2 = vector.load %arg3[%c0_3, %c0_4] : memref<1x256xf32, #tpu.memory_space<vmem>>, vector<1x256xf32>
    %cst = arith.constant dense<0.000000e+00> : vector<8x256xf32>
    %3 = tpu.matmul %0, %1, %cst {dimension_numbers = #tpu.dot_dimension_numbers<[1], [0], [0], [1], [0, 0, 1, 1], [], []>} : vector<8x256xbf16>, vector<256x256xbf16>, vector<8x256xf32> -> vector<8x256xf32>
    %4 = vector.broadcast %2 : vector<1x256xf32> to vector<8x256xf32>
    %5 = arith.addf %3, %4 : vector<8x256xf32>
    %cst_5 = arith.constant 0.000000e+00 : f32
    %6 = vector.broadcast %cst_5 : f32 to vector<8x256xf32>
    %7 = arith.maximumf %5, %6 : vector<8x256xf32>
    %8 = arith.truncf %7 : vector<8x256xf32> to vector<8x256xbf16>
    %c0_6 = arith.constant 0 : index
    %c0_7 = arith.constant 0 : index
    %9 = vector.load %arg4[%c0_6, %c0_7] : memref<256x256xbf16, #tpu.memory_space<vmem>>, vector<256x256xbf16>
    %c0_8 = arith.constant 0 : index
    %c0_9 = arith.constant 0 : index
    %10 = vector.load %arg5[%c0_8, %c0_9] : memref<1x256xf32, #tpu.memory_space<vmem>>, vector<1x256xf32>
    %cst_10 = arith.constant dense<0.000000e+00> : vector<8x256xf32>
    %11 = tpu.matmul %8, %9, %cst_10 {dimension_numbers = #tpu.dot_dimension_numbers<[1], [0], [0], [1], [0, 0, 1, 1], [], []>} : vector<8x256xbf16>, vector<256x256xbf16>, vector<8x256xf32> -> vector<8x256xf32>
    %12 = vector.broadcast %10 : vector<1x256xf32> to vector<8x256xf32>
    %13 = arith.addf %11, %12 : vector<8x256xf32>
    %cst_11 = arith.constant 0.000000e+00 : f32
    %14 = vector.broadcast %cst_11 : f32 to vector<8x256xf32>
    %15 = arith.maximumf %13, %14 : vector<8x256xf32>
    %16 = arith.truncf %15 : vector<8x256xf32> to vector<8x256xbf16>
    %c0_12 = arith.constant 0 : index
    %c0_13 = arith.constant 0 : index
    %17 = vector.load %arg6[%c0_12, %c0_13] : memref<256x256xbf16, #tpu.memory_space<vmem>>, vector<256x256xbf16>
    %c0_14 = arith.constant 0 : index
    %c0_15 = arith.constant 0 : index
    %18 = vector.load %arg7[%c0_14, %c0_15] : memref<1x256xf32, #tpu.memory_space<vmem>>, vector<1x256xf32>
    %cst_16 = arith.constant dense<0.000000e+00> : vector<8x256xf32>
    %19 = tpu.matmul %16, %17, %cst_16 {dimension_numbers = #tpu.dot_dimension_numbers<[1], [0], [0], [1], [0, 0, 1, 1], [], []>} : vector<8x256xbf16>, vector<256x256xbf16>, vector<8x256xf32> -> vector<8x256xf32>
    %20 = vector.broadcast %18 : vector<1x256xf32> to vector<8x256xf32>
    %21 = arith.addf %19, %20 : vector<8x256xf32>
    %c0_17 = arith.constant 0 : index
    %c0_18 = arith.constant 0 : index
    %22 = vector.load %arg8[%c0_17, %c0_18] : memref<8x256xf32, #tpu.memory_space<vmem>>, vector<8x256xf32>
    tpu.vector_store %arg8[%c0_17, %c0_18], %21 {strides = array<i32>} : memref<8x256xf32, #tpu.memory_space<vmem>>, vector<8x256xf32>,
    return
  }
  func.func @transform_0(%arg0: i32) -> (i32, i32) {
    %c0_i32 = arith.constant 0 : i32
    %c0_i32_0 = arith.constant 0 : i32
    return %arg0, %c0_i32 : i32, i32
  }
  func.func @transform_1(%arg0: i32) -> (i32, i32) {
    %c0_i32 = arith.constant 0 : i32
    %c0_i32_0 = arith.constant 0 : i32
    %c0_i32_1 = arith.constant 0 : i32
    return %c0_i32, %c0_i32_0 : i32, i32
  }
  func.func @transform_2(%arg0: i32) -> (i32, i32) {
    %c0_i32 = arith.constant 0 : i32
    %c0_i32_0 = arith.constant 0 : i32
    %c0_i32_1 = arith.constant 0 : i32
    return %c0_i32, %c0_i32_0 : i32, i32
  }
  func.func @transform_3(%arg0: i32) -> (i32, i32) {
    %c0_i32 = arith.constant 0 : i32
    %c0_i32_0 = arith.constant 0 : i32
    %c0_i32_1 = arith.constant 0 : i32
    return %c0_i32, %c0_i32_0 : i32, i32
  }
  func.func @transform_4(%arg0: i32) -> (i32, i32) {
    %c0_i32 = arith.constant 0 : i32
    %c0_i32_0 = arith.constant 0 : i32
    %c0_i32_1 = arith.constant 0 : i32
    return %c0_i32, %c0_i32_0 : i32, i32
  }
  func.func @transform_5(%arg0: i32) -> (i32, i32) {
    %c0_i32 = arith.constant 0 : i32
    %c0_i32_0 = arith.constant 0 : i32
    %c0_i32_1 = arith.constant 0 : i32
    return %c0_i32, %c0_i32_0 : i32, i32
  }
  func.func @transform_6(%arg0: i32) -> (i32, i32) {
    %c0_i32 = arith.constant 0 : i32
    %c0_i32_0 = arith.constant 0 : i32
    %c0_i32_1 = arith.constant 0 : i32
    return %c0_i32, %c0_i32_0 : i32, i32
  }
  func.func @transform_7(%arg0: i32) -> (i32, i32) {
    %c0_i32 = arith.constant 0 : i32
    %c0_i32_0 = arith.constant 0 : i32
    return %arg0, %c0_i32 : i32, i32
  }
}

</mosaic_0001>

<bundles_post_ra>
// kernel: tpu_custom_call.1
= control target key start
LH: loop header
LB: loop body
LE: loop exit
PB: predicated region body
PF: predicated region fallthrough
CT: control target
= control target key end

     0   :  { %12 = vsyncpa [#allocation3], 0  ;;  %s1600_s0 = inlined_call_operand.hbm [shape: bf16[8,256], index: 0, kind: input, shape index: {}]   ;;  %s1601_s1 = inlined_call_operand.hbm [shape: bf16[256,256], index: 1, kind: input, shape index: {}]   ;;  %s1602_s2 = inlined_call_operand.hbm [shape: f32[1,256], index: 2, kind: input, shape index: {}]   ;;  %s1603_s3 = inlined_call_operand.hbm [shape: bf16[256,256], index: 3, kind: input, shape index: {}]   ;;  %s1604_s4 = inlined_call_operand.vmem [shape: f32[1,256], index: 4, kind: input, shape index: {}]   ;;  %s1605_s5 = inlined_call_operand.hbm [shape: bf16[256,256], index: 5, kind: input, shape index: {}]   ;;  %s1606_s6 = inlined_call_operand.vmem [shape: f32[1,256], index: 6, kind: input, shape index: {}]   ;;  %s1607_s7 = inlined_call_operand.hbm [shape: f32[8,256], index: 7, kind: output, shape index: {}]  }
   0x1   :  { %13 = vsyncpa [#allocation6], 0 }
   0x2   :  { %14 = vsyncpa [#allocation9], 0  ;;  %s31_s26 = sshll.u32 %s1601_s1, 4  ;;  %s32_s26 = int_to_ptr.hbm [resolvable:$true] %s31_s26 }
   0x3   :  { %15 = vsyncpa [#allocation4], 0  ;;  %s1528_s27 = smov [#allocation5]   ;;  %s55_s8 = sshll.u32 %s1603_s3, 4  ;;  %s56_s8 = int_to_ptr.hbm [resolvable:$true] %s55_s8 }
   0x4   :  { %s33_s28 = sshll.u32 %s1528_s27, 4  ;;  %s1529_s9 = smov 128   ;;  %s34_s28 = int_to_ptr.vmem [resolvable:$true] %s33_s28 }
   0x5   :  { %s1530_s10 = smov 8   ;;  %s1531_s11 = smov [#allocation8]  }
   0x6   :  { %39 = dma.hbm_to_vmem [thread:$0]  %s32_s26, 4096, %s34_s28, [#allocation6], %s1529_s9, %s1529_s9, %s1530_s10  }
   0x7   :  { %s57_s12 = sshll.u32 %s1531_s11, 4  ;;  %s21_s15 = sshll.u32 %s1600_s0, 4  ;;  %s58_s12 = int_to_ptr.vmem [resolvable:$true] %s57_s12  ;;  %s22_s15 = int_to_ptr.hbm [resolvable:$true] %s21_s15 }
   0x8   :  { %63 = dma.hbm_to_vmem [thread:$0]  %s56_s8, 4096, %s58_s12, [#allocation9], %s1529_s9, %s1529_s9, %s1530_s10  }
   0x9   :  { %s45_s17 = sshll.u32 %s1602_s2, 4  ;;  %s1532_s18 = smov [#allocation2]   ;;  %s46_s17 = int_to_ptr.hbm [resolvable:$true] %s45_s17 }
   0xa   :  { %s23_s19 = sshll.u32 %s1532_s18, 4  ;;  %s1533_s3 = smov [#allocation7]   ;;  %s24_s19 = int_to_ptr.vmem [resolvable:$true] %s23_s19 }
   0xb   :  { %26 = dma.hbm_to_vmem [thread:$0]  %s22_s15, 128, %s24_s19, [#allocation3]  }
   0xc   :  { %s47_s20 = sshll.u32 %s1533_s3, 4  ;;  %s70_s23 = sshll.u32 %s1605_s5, 4  ;;  %s48_s20 = int_to_ptr.vmem [resolvable:$true] %s47_s20  ;;  %s71_s23 = int_to_ptr.hbm [resolvable:$true] %s70_s23 }
   0xd   :  { %50 = dma.hbm_to_vmem [thread:$0]  %s46_s17, 32, %s48_s20, [#allocation6]  }
   0xe   :  { %s1534_s0 = smov [#allocation10]  }
   0xf   :  { %s72_s24 = sshll.u32 %s1534_s0, 4  ;;  %s73_s24 = int_to_ptr.vmem [resolvable:$true] %s72_s24 }
  0x10   :  { %78 = dma.hbm_to_vmem [thread:$0]  %s71_s23, 4096, %s73_s24, [#allocation9], %s1529_s9, %s1529_s9, %s1530_s10  }
  0x11   :  { %1520 = dma.done.wait [#allocation3], 128  }
  0x12   :  { %1521 = vsyncadd [#allocation3], 4294967168 }
  0x13   :  { %1522 = dma.done.wait [#allocation6], 4128  }
  0x14   :  { %1523 = vsyncadd [#allocation6], 4294963168 }
  0x15   :  { %1524 = dma.done.wait [#allocation9], 8192  }
  0x16   :  { %1525 = vsyncadd [#allocation9], 4294959104  ;;  %v946_v0 = vld [vmem:[#allocation5 + $0x70] sm:$0xf]  ;;  %v1287_v1 = vld [vmem:[#allocation5 + $0x74] sm:$0xf0] }
  0x17   :  { %v1010_v2 = vld [vmem:[#allocation5 + $0xf0] sm:$0xf]  ;;  %v947_v3 = vor.u32 %v1287_v1, %v946_v0  ;;  %v1303_v4 = vld [vmem:[#allocation5 + $0xf4] sm:$0xf0]  ;;  %v1286_v5 = vld [vmem:[#allocation5 + $0x74] sm:$0xf] }
  0x18   :  { %v948_v6 = vld [vmem:[#allocation5 + $0x78] sm:$0xf0]  ;;  %v1011_v7 = vor.u32 %v1303_v4, %v1010_v2  ;;  %v1302_v9 = vld [vmem:[#allocation5 + $0xf4] sm:$0xf]  ;;  %v938_v11 = vld [vmem:[#allocation5 + $0x60] sm:$0xf] }
  0x19   :  { %v951_v8 = vor.u32 %v1286_v5, %v948_v6  ;;  %v1012_v10 = vld [vmem:[#allocation5 + $0xf8] sm:$0xf0]  ;;  %307 = vmatpush.bf16.msra.mxu0 %v947_v3  ;;  %v1285_v13 = vld [vmem:[#allocation5 + $0x64] sm:$0xf0]  ;;  %v1002_v14 = vld [vmem:[#allocation5 + $0xe0] sm:$0xf] }
  0x1a   :  { %v1015_v12 = vor.u32 %v1302_v9, %v1012_v10  ;;  %v1301_v15 = vld [vmem:[#allocation5 + $0xe4] sm:$0xf0]  ;;  %320 = vmatpush.bf16.msra.mxu1 %v1011_v7  ;;  %v939_v16 = vor.u32 %v1285_v13, %v938_v11  ;;  %v1284_v18 = vld [vmem:[#allocation5 + $0x64] sm:$0xf]  ;;  %v940_v19 = vld [vmem:[#allocation5 + $0x68] sm:$0xf0] }
  0x1b   :  { %333 = vmatpush.bf16.msra.mxu2 %v951_v8  ;;  %v1003_v17 = vor.u32 %v1301_v15, %v1002_v14  ;;  %v1300_v20 = vld [vmem:[#allocation5 + $0xe4] sm:$0xf]  ;;  %v943_v21 = vor.u32 %v1284_v18, %v940_v19  ;;  %v1004_v22 = vld [vmem:[#allocation5 + $0xe8] sm:$0xf0]  ;;  %v930_v23 = vld [vmem:[#allocation5 + $0x50] sm:$0xf] }
  0x1c   :  { %346 = vmatpush.bf16.msra.mxu3 %v1015_v12  ;;  %v1283_v24 = vld [vmem:[#allocation5 + $0x54] sm:$0xf0]  ;;  %v1007_v25 = vor.u32 %v1300_v20, %v1004_v22  ;;  %v994_v26 = vld [vmem:[#allocation5 + $0xd0] sm:$0xf]  ;;  %v1282_v28 = vld [vmem:[#allocation5 + $0x54] sm:$0xf] }
  0x1d   :  { %v1299_v27 = vld [vmem:[#allocation5 + $0xd4] sm:$0xf0]  ;;  %308 = vmatpush.bf16.msra.mxu0 %v939_v16  ;;  %v931_v29 = vor.u32 %v1283_v24, %v930_v23  ;;  %v932_v30 = vld [vmem:[#allocation5 + $0x58] sm:$0xf0]  ;;  %v1298_v31 = vld [vmem:[#allocation5 + $0xd4] sm:$0xf] }
  0x1e   :  { %v996_v32 = vld [vmem:[#allocation5 + $0xd8] sm:$0xf0]  ;;  %321 = vmatpush.bf16.msra.mxu1 %v1003_v17  ;;  %v995_v33 = vor.u32 %v1299_v27, %v994_v26  ;;  %v935_v34 = vor.u32 %v1282_v28, %v932_v30  ;;  %v922_v35 = vld [vmem:[#allocation5 + $0x40] sm:$0xf]  ;;  %v1281_v36 = vld [vmem:[#allocation5 + $0x44] sm:$0xf0] }
  0x1f   :  { %334 = vmatpush.bf16.msra.mxu2 %v943_v21  ;;  %v986_v37 = vld [vmem:[#allocation5 + $0xc0] sm:$0xf]  ;;  %v999_v38 = vor.u32 %v1298_v31, %v996_v32  ;;  %v1297_v39 = vld [vmem:[#allocation5 + $0xc4] sm:$0xf0]  ;;  %v1280_v40 = vld [vmem:[#allocation5 + $0x44] sm:$0xf]  ;;  %v923_v44 = vor.u32 %v1281_v36, %v922_v35 }
  0x20   :  { %347 = vmatpush.bf16.msra.mxu3 %v1007_v25  ;;  %v924_v41 = vld [vmem:[#allocation5 + $0x48] sm:$0xf0]  ;;  %v1296_v42 = vld [vmem:[#allocation5 + $0xc4] sm:$0xf]  ;;  %v987_v45 = vor.u32 %v1297_v39, %v986_v37  ;;  %v914_v47 = vld [vmem:[#allocation5 + $0x30] sm:$0xf] }
  0x21   :  { %v988_v43 = vld [vmem:[#allocation5 + $0xc8] sm:$0xf0]  ;;  %309 = vmatpush.bf16.msra.mxu0 %v931_v29  ;;  %v927_v46 = vor.u32 %v1280_v40, %v924_v41  ;;  %v1279_v48 = vld [vmem:[#allocation5 + $0x34] sm:$0xf0]  ;;  %v978_v49 = vld [vmem:[#allocation5 + $0xb0] sm:$0xf] }
  0x22   :  { %322 = vmatpush.bf16.msra.mxu1 %v995_v33  ;;  %v991_v50 = vor.u32 %v1296_v42, %v988_v43  ;;  %v1295_v51 = vld [vmem:[#allocation5 + $0xb4] sm:$0xf0]  ;;  %v1278_v52 = vld [vmem:[#allocation5 + $0x34] sm:$0xf]  ;;  %v916_v53 = vld [vmem:[#allocation5 + $0x38] sm:$0xf0]  ;;  %v915_v56 = vor.u32 %v1279_v48, %v914_v47 }
  0x23   :  { %335 = vmatpush.bf16.msra.mxu2 %v935_v34  ;;  %v1294_v54 = vld [vmem:[#allocation5 + $0xb4] sm:$0xf]  ;;  %v980_v55 = vld [vmem:[#allocation5 + $0xb8] sm:$0xf0]  ;;  %v979_v57 = vor.u32 %v1295_v51, %v978_v49  ;;  %v919_v58 = vor.u32 %v1278_v52, %v916_v53  ;;  %v906_v59 = vld [vmem:[#allocation5 + $0x20] sm:$0xf] }
  0x24   :  { %348 = vmatpush.bf16.msra.mxu3 %v999_v38  ;;  %v1277_v60 = vld [vmem:[#allocation5 + $0x24] sm:$0xf0]  ;;  %v970_v61 = vld [vmem:[#allocation5 + $0xa0] sm:$0xf]  ;;  %v983_v62 = vor.u32 %v1294_v54, %v980_v55  ;;  %v1276_v0 = vld [vmem:[#allocation5 + $0x24] sm:$0xf] }
  0x25   :  { %310 = vmatpush.bf16.msra.mxu0 %v923_v44  ;;  %v1293_v63 = vld [vmem:[#allocation5 + $0xa4] sm:$0xf0]  ;;  %v908_v1 = vld [vmem:[#allocation5 + $0x28] sm:$0xf0]  ;;  %v1292_v2 = vld [vmem:[#allocation5 + $0xa4] sm:$0xf]  ;;  %v907_v4 = vor.u32 %v1277_v60, %v906_v59 }
  0x26   :  { %323 = vmatpush.bf16.msra.mxu1 %v987_v45  ;;  %v972_v3 = vld [vmem:[#allocation5 + $0xa8] sm:$0xf0]  ;;  %v971_v5 = vor.u32 %v1293_v63, %v970_v61  ;;  %v911_v6 = vor.u32 %v1276_v0, %v908_v1  ;;  %v898_v7 = vld [vmem:[#allocation5 + $0x10] sm:$0xf]  ;;  %v1275_v8 = vld [vmem:[#allocation5 + $0x14] sm:$0xf0] }
  0x27   :  { %336 = vmatpush.bf16.msra.mxu2 %v927_v46  ;;  %v962_v9 = vld [vmem:[#allocation5 + $0x90] sm:$0xf]  ;;  %v975_v10 = vor.u32 %v1292_v2, %v972_v3  ;;  %v1291_v11 = vld [vmem:[#allocation5 + $0x94] sm:$0xf0]  ;;  %v1274_v12 = vld [vmem:[#allocation5 + $0x14] sm:$0xf]  ;;  %v899_v16 = vor.u32 %v1275_v8, %v898_v7 }
  0x28   :  { %349 = vmatpush.bf16.msra.mxu3 %v991_v50  ;;  %v900_v13 = vld [vmem:[#allocation5 + $0x18] sm:$0xf0]  ;;  %v1290_v14 = vld [vmem:[#allocation5 + $0x94] sm:$0xf]  ;;  %v890_v17 = vld [vmem:[#allocation5] sm:$0xf]  ;;  %v963_v19 = vor.u32 %v1291_v11, %v962_v9 }
  0x29   :  { %311 = vmatpush.bf16.msra.mxu0 %v915_v56  ;;  %v964_v15 = vld [vmem:[#allocation5 + $0x98] sm:$0xf0]  ;;  %v903_v20 = vor.u32 %v1274_v12, %v900_v13  ;;  %v1273_v21 = vld [vmem:[#allocation5 + $0x4] sm:$0xf0]  ;;  %v954_v22 = vld [vmem:[#allocation5 + $0x80] sm:$0xf] }
  0x2a   :  { %324 = vmatpush.bf16.msra.mxu1 %v979_v57  ;;  %v101_v18 = vld [vmem:[#allocation2] sm:$0xff]  ;;  %v1289_v23 = vld [vmem:[#allocation5 + $0x84] sm:$0xf0]  ;;  %v967_v24 = vor.u32 %v1290_v14, %v964_v15  ;;  %v1272_v25 = vld [vmem:[#allocation5 + $0x4] sm:$0xf]  ;;  %v891_v32 = vor.u32 %v1273_v21, %v890_v17  ;;  %s1535_s26 = smov [#allocation11]  }
  0x2b   :  { %337 = vmatpush.bf16.msra.mxu2 %v919_v58  ;;  %v892_v26 = vld [vmem:[#allocation5 + $0x8] sm:$0xf0]  ;;  %v1288_v27 = vld [vmem:[#allocation5 + $0x84] sm:$0xf]  ;;  %v141_v29 = vunpack.c.l.b16 %v101_v18  ;;  %v1074_v30 = vld [vmem:[#allocation8 + $0x70] sm:$0xf]  ;;  %v142_v33 = vunpack.c.h.b16 %v101_v18  ;;  %v955_v36 = vor.u32 %v1289_v23, %v954_v22 }
  0x2c   :  { %350 = vmatpush.bf16.msra.mxu3 %v983_v62  ;;  %v956_v28 = vld [vmem:[#allocation5 + $0x88] sm:$0xf0]  ;;  %v1319_v31 = vld [vmem:[#allocation8 + $0x74] sm:$0xf0]  ;;  %v1318_v34 = vld [vmem:[#allocation8 + $0x74] sm:$0xf]  ;;  %v895_v37 = vor.u32 %v1272_v25, %v892_v26 }
  0x2d   :  { %312 = vmatpush.bf16.msra.mxu0 %v907_v4  ;;  %v1076_v35 = vld [vmem:[#allocation8 + $0x78] sm:$0xf0]  ;;  %v959_v38 = vor.u32 %v1288_v27, %v956_v28  ;;  %v1075_v39 = vor.u32 %v1319_v31, %v1074_v30  ;;  %v1066_v40 = vld [vmem:[#allocation8 + $0x60] sm:$0xf]  ;;  %v1138_v41 = vld [vmem:[#allocation8 + $0xf0] sm:$0xf]  ;;  %v143_v43 = vpack.c.b16 %v141_v29, %v141_v29  ;;  %v144_v48 = vpack.c.b16 %v142_v33, %v142_v33 }
  0x2e   :  { %325 = vmatpush.bf16.msra.mxu1 %v971_v5  ;;  %v1335_v42 = vld [vmem:[#allocation8 + $0xf4] sm:$0xf0]  ;;  %v1079_v44 = vor.u32 %v1318_v34, %v1076_v35  ;;  %v1317_v45 = vld [vmem:[#allocation8 + $0x64] sm:$0xf0]  ;;  %v1334_v46 = vld [vmem:[#allocation8 + $0xf4] sm:$0xf] }
  0x2f   :  { %338 = vmatpush.bf16.msra.mxu2 %v911_v6  ;;  %v1140_v47 = vld [vmem:[#allocation8 + $0xf8] sm:$0xf0]  ;;  %v1316_v49 = vld [vmem:[#allocation8 + $0x64] sm:$0xf]  ;;  %v1068_v50 = vld [vmem:[#allocation8 + $0x68] sm:$0xf0]  ;;  %v1139_v51 = vor.u32 %v1335_v42, %v1138_v41  ;;  %v1067_v52 = vor.u32 %v1317_v45, %v1066_v40 }
  0x30   :  { %351 = vmatpush.bf16.msra.mxu3 %v975_v10  ;;  %v1143_v53 = vor.u32 %v1334_v46, %v1140_v47  ;;  %v1058_v54 = vld [vmem:[#allocation8 + $0x50] sm:$0xf]  ;;  %v1130_v55 = vld [vmem:[#allocation8 + $0xe0] sm:$0xf]  ;;  %v1333_v56 = vld [vmem:[#allocation8 + $0xe4] sm:$0xf0]  ;;  %v1071_v57 = vor.u32 %v1316_v49, %v1068_v50 }
  0x31   :  { %313 = vmatpush.bf16.msra.mxu0 %v899_v16  ;;  %v1315_v58 = vld [vmem:[#allocation8 + $0x54] sm:$0xf0]  ;;  %v1332_v59 = vld [vmem:[#allocation8 + $0xe4] sm:$0xf]  ;;  %v1132_v60 = vld [vmem:[#allocation8 + $0xe8] sm:$0xf0]  ;;  %v1131_v63 = vor.u32 %v1333_v56, %v1130_v55 }
  0x32   :  { %326 = vmatpush.bf16.msra.mxu1 %v963_v19  ;;  %v1314_v61 = vld [vmem:[#allocation8 + $0x54] sm:$0xf]  ;;  %v1060_v62 = vld [vmem:[#allocation8 + $0x58] sm:$0xf0]  ;;  %v1059_v0 = vor.u32 %v1315_v58, %v1058_v54  ;;  %v1135_v1 = vor.u32 %v1332_v59, %v1132_v60  ;;  %v1050_v2 = vld [vmem:[#allocation8 + $0x40] sm:$0xf] }
  0x33   :  { %339 = vmatpush.bf16.msra.mxu2 %v903_v20  ;;  %v1122_v3 = vld [vmem:[#allocation8 + $0xd0] sm:$0xf]  ;;  %v1331_v4 = vld [vmem:[#allocation8 + $0xd4] sm:$0xf0]  ;;  %v1063_v5 = vor.u32 %v1314_v61, %v1060_v62  ;;  %v1313_v6 = vld [vmem:[#allocation8 + $0x44] sm:$0xf0] }
  0x34   :  { %352 = vmatpush.bf16.msra.mxu3 %v967_v24  ;;  %v1330_v7 = vld [vmem:[#allocation8 + $0xd4] sm:$0xf]  ;;  %v1124_v8 = vld [vmem:[#allocation8 + $0xd8] sm:$0xf0]  ;;  %v1312_v9 = vld [vmem:[#allocation8 + $0x44] sm:$0xf]  ;;  %v1123_v11 = vor.u32 %v1331_v4, %v1122_v3  ;;  %v1051_v12 = vor.u32 %v1313_v6, %v1050_v2 }
  0x35   :  { %314 = vmatpush.bf16.msra.mxu0 %v891_v32  ;;  %v1052_v10 = vld [vmem:[#allocation8 + $0x48] sm:$0xf0]  ;;  %v1127_v13 = vor.u32 %v1330_v7, %v1124_v8  ;;  %v1042_v14 = vld [vmem:[#allocation8 + $0x30] sm:$0xf]  ;;  %v1114_v15 = vld [vmem:[#allocation8 + $0xc0] sm:$0xf] }
  0x36   :  { %327 = vmatpush.bf16.msra.mxu1 %v955_v36  ;;  %v1329_v16 = vld [vmem:[#allocation8 + $0xc4] sm:$0xf0]  ;;  %v1055_v17 = vor.u32 %v1312_v9, %v1052_v10  ;;  %v1311_v18 = vld [vmem:[#allocation8 + $0x34] sm:$0xf0]  ;;  %v1328_v19 = vld [vmem:[#allocation8 + $0xc4] sm:$0xf] }
  0x37   :  { %340 = vmatpush.bf16.msra.mxu2 %v895_v37  ;;  %v1116_v20 = vld [vmem:[#allocation8 + $0xc8] sm:$0xf0]  ;;  %v1310_v21 = vld [vmem:[#allocation8 + $0x34] sm:$0xf]  ;;  %v1044_v22 = vld [vmem:[#allocation8 + $0x38] sm:$0xf0]  ;;  %v1115_v23 = vor.u32 %v1329_v16, %v1114_v15  ;;  %v1043_v24 = vor.u32 %v1311_v18, %v1042_v14 }
  0x38   :  { %353 = vmatpush.bf16.msra.mxu3 %v959_v38  ;;  %315 = vmatmul.bf16.vlgmr.msra.gmra.mxu0 %v143_v43  ;;  %v1119_v25 = vor.u32 %v1328_v19, %v1116_v20  ;;  %v1047_v26 = vor.u32 %v1310_v21, %v1044_v22  ;;  %v1034_v27 = vld [vmem:[#allocation8 + $0x20] sm:$0xf]  ;;  %v1309_v28 = vld [vmem:[#allocation8 + $0x24] sm:$0xf0]  ;;  %v1308_v29 = vld [vmem:[#allocation8 + $0x24] sm:$0xf] }
  0x39   :  { %561 = vmatpush.bf16.msrb.mxu0 %v1075_v39  ;;  %328 = vmatmul.bf16.vlgmr.msra.gmra.mxu1 %v144_v48  ;;  %v1036_v30 = vld [vmem:[#allocation8 + $0x28] sm:$0xf0]  ;;  %v1035_v31 = vor.u32 %v1309_v28, %v1034_v27  ;;  %v1106_v33 = vld [vmem:[#allocation8 + $0xb0] sm:$0xf]  ;;  %v1327_v34 = vld [vmem:[#allocation8 + $0xb4] sm:$0xf0] }
  0x3a   :  { %341 = vmatmul.bf16.vlgmr.msra.gmra.mxu2 %v143_v43  ;;  %574 = vmatpush.bf16.msrb.mxu1 %v1139_v51  ;;  %v1039_v32 = vor.u32 %v1308_v29, %v1036_v30  ;;  %v1326_v35 = vld [vmem:[#allocation8 + $0xb4] sm:$0xf]  ;;  %v1107_v36 = vor.u32 %v1327_v34, %v1106_v33  ;;  %v1108_v37 = vld [vmem:[#allocation8 + $0xb8] sm:$0xf0]  ;;  %v1026_v39 = vld [vmem:[#allocation8 + $0x10] sm:$0xf] }
  0x3b   :  { %587 = vmatpush.bf16.msrb.mxu2 %v1079_v44  ;;  %354 = vmatmul.bf16.vlgmr.msra.gmra.mxu3 %v144_v48  ;;  %v1111_v38 = vor.u32 %v1326_v35, %v1108_v37  ;;  %v1307_v40 = vld [vmem:[#allocation8 + $0x14] sm:$0xf0]  ;;  %v1306_v41 = vld [vmem:[#allocation8 + $0x14] sm:$0xf]  ;;  %v1028_v43 = vld [vmem:[#allocation8 + $0x18] sm:$0xf0] }
  0x3c   :  { %600 = vmatpush.bf16.msrb.mxu3 %v1143_v53  ;;  %v1027_v42 = vor.u32 %v1307_v40, %v1026_v39  ;;  %v1031_v44 = vor.u32 %v1306_v41, %v1028_v43  ;;  %v1098_v45 = vld [vmem:[#allocation8 + $0xa0] sm:$0xf]  ;;  %v1325_v46 = vld [vmem:[#allocation8 + $0xa4] sm:$0xf0]  ;;  %v1324_v47 = vld [vmem:[#allocation8 + $0xa4] sm:$0xf] }
  0x3d   :  { %562 = vmatpush.bf16.msrb.mxu0 %v1067_v52  ;;  %v1099_v48 = vor.u32 %v1325_v46, %v1098_v45  ;;  %v1100_v49 = vld [vmem:[#allocation8 + $0xa8] sm:$0xf0]  ;;  %v1018_v51 = vld [vmem:[#allocation8] sm:$0xf]  ;;  %v1305_v52 = vld [vmem:[#allocation8 + $0x4] sm:$0xf0] }
  0x3e   :  { %575 = vmatpush.bf16.msrb.mxu1 %v1131_v63  ;;  %v1103_v50 = vor.u32 %v1324_v47, %v1100_v49  ;;  %v1304_v53 = vld [vmem:[#allocation8 + $0x4] sm:$0xf]  ;;  %v1019_v54 = vor.u32 %v1305_v52, %v1018_v51  ;;  %v1020_v55 = vld [vmem:[#allocation8 + $0x8] sm:$0xf0]  ;;  %v1323_v58 = vld [vmem:[#allocation8 + $0x94] sm:$0xf0] }
  0x3f   :  { %588 = vmatpush.bf16.msrb.mxu2 %v1071_v57  ;;  %v1023_v56 = vor.u32 %v1304_v53, %v1020_v55  ;;  %v1090_v57 = vld [vmem:[#allocation8 + $0x90] sm:$0xf]  ;;  %v1322_v60 = vld [vmem:[#allocation8 + $0x94] sm:$0xf]  ;;  %v1092_v61 = vld [vmem:[#allocation8 + $0x98] sm:$0xf0] }
  0x40   :  { %601 = vmatpush.bf16.msrb.mxu3 %v1135_v1  ;;  %v1091_v59 = vor.u32 %v1323_v58, %v1090_v57  ;;  %v1095_v62 = vor.u32 %v1322_v60, %v1092_v61  ;;  %v1082_v63 = vld [vmem:[#allocation8 + $0x80] sm:$0xf]  ;;  %v1320_v1 = vld [vmem:[#allocation8 + $0x84] sm:$0xf]  ;;  %v1084_v3 = vld [vmem:[#allocation8 + $0x88] sm:$0xf0] }
  0x41   :  { %563 = vmatpush.bf16.msrb.mxu0 %v1059_v0  ;;  %v1321_v0 = vld [vmem:[#allocation8 + $0x84] sm:$0xf0]  ;;  %v1087_v4 = vor.u32 %v1320_v1, %v1084_v3  ;;  %v1351_v6 = vld [vmem:[#allocation10 + $0x74] sm:$0xf0]  ;;  %v1350_v7 = vld [vmem:[#allocation10 + $0x74] sm:$0xf] }
  0x42   :  { %576 = vmatpush.bf16.msrb.mxu1 %v1123_v11  ;;  %v1083_v2 = vor.u32 %v1321_v0, %v1082_v63  ;;  %v1204_v9 = vld [vmem:[#allocation10 + $0x78] sm:$0xf0]  ;;  %v1194_v10 = vld [vmem:[#allocation10 + $0x60] sm:$0xf]  ;;  %v1349_v11 = vld [vmem:[#allocation10 + $0x64] sm:$0xf0] }
  0x43   :  { %589 = vmatpush.bf16.msrb.mxu2 %v1063_v5  ;;  %v1202_v5 = vld [vmem:[#allocation10 + $0x70] sm:$0xf]  ;;  %v1196_v14 = vld [vmem:[#allocation10 + $0x68] sm:$0xf0]  ;;  %v1195_v16 = vor.u32 %v1349_v11, %v1194_v10  ;;  %v1366_v18 = vld [vmem:[#allocation10 + $0xf4] sm:$0xf] }
  0x44   :  { %602 = vmatpush.bf16.msrb.mxu3 %v1127_v13  ;;  %v1203_v8 = vor.u32 %v1351_v6, %v1202_v5  ;;  %v1348_v13 = vld [vmem:[#allocation10 + $0x64] sm:$0xf]  ;;  %v1266_v15 = vld [vmem:[#allocation10 + $0xf0] sm:$0xf]  ;;  %v1268_v19 = vld [vmem:[#allocation10 + $0xf8] sm:$0xf0] }
  0x45   :  { %564 = vmatpush.bf16.msrb.mxu0 %v1051_v12  ;;  %v1207_v12 = vor.u32 %v1350_v7, %v1204_v9  ;;  %v1199_v20 = vor.u32 %v1348_v13, %v1196_v14  ;;  %v1271_v22 = vor.u32 %v1366_v18, %v1268_v19  ;;  %v1258_v27 = vld [vmem:[#allocation10 + $0xe0] sm:$0xf]  ;;  %v1365_v28 = vld [vmem:[#allocation10 + $0xe4] sm:$0xf0]  ;;  %v1364_v30 = vld [vmem:[#allocation10 + $0xe4] sm:$0xf] }
  0x46   :  { %577 = vmatpush.bf16.msrb.mxu1 %v1115_v23  ;;  %v1186_v23 = vld [vmem:[#allocation10 + $0x50] sm:$0xf]  ;;  %v1259_v29 = vor.u32 %v1365_v28, %v1258_v27  ;;  %v1178_v34 = vld [vmem:[#allocation10 + $0x40] sm:$0xf]  ;;  %v1345_v35 = vld [vmem:[#allocation10 + $0x44] sm:$0xf0] }
  0x47   :  { %590 = vmatpush.bf16.msrb.mxu2 %v1055_v17  ;;  %v1367_v17 = vld [vmem:[#allocation10 + $0xf4] sm:$0xf0]  ;;  %v1250_v37 = vld [vmem:[#allocation10 + $0xd0] sm:$0xf]  ;;  %v1362_v39 = vld [vmem:[#allocation10 + $0xd4] sm:$0xf]  ;;  %v1179_v46 = vor.u32 %v1345_v35, %v1178_v34 }
  0x48   :  { %603 = vmatpush.bf16.msrb.mxu3 %v1119_v25  ;;  %v1267_v21 = vor.u32 %v1367_v17, %v1266_v15  ;;  %v1346_v25 = vld [vmem:[#allocation10 + $0x54] sm:$0xf]  ;;  %v1344_v40 = vld [vmem:[#allocation10 + $0x44] sm:$0xf]  ;;  %v1180_v41 = vld [vmem:[#allocation10 + $0x48] sm:$0xf0] }
  0x49   :  { %565 = vmatpush.bf16.msrb.mxu0 %v1043_v24  ;;  %v1347_v24 = vld [vmem:[#allocation10 + $0x54] sm:$0xf0]  ;;  %v134_v43 = vld [vmem:[#allocation7] sm:$0x3]  ;;  %v1183_v47 = vor.u32 %v1344_v40, %v1180_v41  ;;  %v1342_v51 = vld [vmem:[#allocation10 + $0x34] sm:$0xf] }
  0x4a   :  { %578 = vmatpush.bf16.msrb.mxu1 %v1107_v36  ;;  %v1343_v49 = vld [vmem:[#allocation10 + $0x34] sm:$0xf0]  ;;  %v1172_v52 = vld [vmem:[#allocation10 + $0x38] sm:$0xf0]  ;;  %v1361_v9 = vld [vmem:[#allocation10 + $0xc4] sm:$0xf0] }
  0x4b   :  { %591 = vmatpush.bf16.msrb.mxu2 %v1047_v26  ;;  %v1188_v26 = vld [vmem:[#allocation10 + $0x58] sm:$0xf0]  ;;  %v1175_v55 = vor.u32 %v1342_v51, %v1172_v52  ;;  %v1360_v10 = vld [vmem:[#allocation10 + $0xc4] sm:$0xf]  ;;  %v1162_v14 = vld [vmem:[#allocation10 + $0x20] sm:$0xf] }
  0x4c   :  { %604 = vmatpush.bf16.msrb.mxu3 %v1111_v38  ;;  %v1191_v36 = vor.u32 %v1346_v25, %v1188_v26  ;;  %v1363_v38 = vld [vmem:[#allocation10 + $0xd4] sm:$0xf0]  ;;  %v1341_v15 = vld [vmem:[#allocation10 + $0x24] sm:$0xf0]  ;;  %v1164_v18 = vld [vmem:[#allocation10 + $0x28] sm:$0xf0] }
  0x4d   :  { %566 = vmatpush.bf16.msrb.mxu0 %v1035_v31  ;;  %v1260_v31 = vld [vmem:[#allocation10 + $0xe8] sm:$0xf0]  ;;  %v1163_v17 = vor.u32 %v1341_v15, %v1162_v14  ;;  %v1234_v19 = vld [vmem:[#allocation10 + $0xb0] sm:$0xf]  ;;  %v1339_v27 = vld [vmem:[#allocation10 + $0x14] sm:$0xf0] }
  0x4e   :  { %579 = vmatpush.bf16.msrb.mxu1 %v1099_v48  ;;  %v1263_v33 = vor.u32 %v1364_v30, %v1260_v31  ;;  %v1170_v48 = vld [vmem:[#allocation10 + $0x30] sm:$0xf]  ;;  %v1338_v28 = vld [vmem:[#allocation10 + $0x14] sm:$0xf]  ;;  %v1156_v30 = vld [vmem:[#allocation10 + $0x18] sm:$0xf0] }
  0x4f   :  { %592 = vmatpush.bf16.msrb.mxu2 %v1039_v32  ;;  %v1187_v32 = vor.u32 %v1347_v24, %v1186_v23  ;;  %v1171_v53 = vor.u32 %v1343_v49, %v1170_v48  ;;  %v1358_v23 = vld [vmem:[#allocation10 + $0xb4] sm:$0xf]  ;;  %v1236_v24 = vld [vmem:[#allocation10 + $0xb8] sm:$0xf0]  ;;  %v1154_v26 = vld [vmem:[#allocation10 + $0x10] sm:$0xf]  ;;  %v1159_v31 = vor.u32 %v1338_v28, %v1156_v30 }
  0x50   :  { %605 = vmatpush.bf16.msrb.mxu3 %v1103_v50  ;;  %v136_v50 = vperm.slane %v134_v43, 0  ;;  %v1239_v25 = vor.u32 %v1358_v23, %v1236_v24  ;;  %v1356_v34 = vld [vmem:[#allocation10 + $0xa4] sm:$0xf]  ;;  %v1220_v48 = vld [vmem:[#allocation10 + $0x98] sm:$0xf0]  ;;  %s874_s27 = sshll.u32 %s1535_s26, 4  ;;  %s875_s27 = int_to_ptr.vmem [resolvable:$true] %s874_s27 }
  0x51   :  { %567 = vmatpush.bf16.msrb.mxu0 %v1027_v42  ;;  %v1252_v42 = vld [vmem:[#allocation10 + $0xd8] sm:$0xf0]  ;;  %v1336_v40 = vld [vmem:[#allocation10 + $0x4] sm:$0xf]  ;;  %v1353_v51 = vld [vmem:[#allocation10 + $0x84] sm:$0xf0] }
  0x52   :  { %580 = vmatpush.bf16.msrb.mxu1 %v1091_v59  ;;  %v1255_v45 = vor.u32 %v1362_v39, %v1252_v42  ;;  %v137_v59 = vperm.slane %v134_v43, 1  ;;  %v1337_v39 = vld [vmem:[#allocation10 + $0x4] sm:$0xf0]  ;;  %v1148_v42 = vld [vmem:[#allocation10 + $0x8] sm:$0xf0]  ;;  %s876_s30 = sshll.u32 %s1607_s7, 4  ;;  %s877_s30 = int_to_ptr.hbm [resolvable:$true] %s876_s30 }
  0x53   :  { %593 = vmatpush.bf16.msrb.mxu2 %v1031_v44  ;;  %v1251_v44 = vor.u32 %v1363_v38, %v1250_v37  ;;  %v1146_v38 = vld [vmem:[#allocation10] sm:$0xf]  ;;  %v1151_v43 = vor.u32 %v1336_v40, %v1148_v42  ;;  %v1352_v52 = vld [vmem:[#allocation10 + $0x84] sm:$0xf] }
  0x54   :  { %606 = vmatpush.bf16.msrb.mxu3 %v1095_v62  ;;  %v1147_v41 = vor.u32 %v1337_v39, %v1146_v38 }
  0x55   :  { %568 = vmatpush.bf16.msrb.mxu0 %v1019_v54 }
  0x56   :  { %581 = vmatpush.bf16.msrb.mxu1 %v1083_v2 }
  0x57   :  { %594 = vmatpush.bf16.msrb.mxu2 %v1023_v56 }
  0x58   :  { %607 = vmatpush.bf16.msrb.mxu3 %v1087_v4 }
  0x59   :  { %815 = vmatpush.bf16.msra.mxu0 %v1203_v8  ;;  %v1242_v8 = vld [vmem:[#allocation10 + $0xc0] sm:$0xf] }
  0x5a   :  { %828 = vmatpush.bf16.msra.mxu1 %v1267_v21  ;;  %v1243_v11 = vor.u32 %v1361_v9, %v1242_v8 }
  0x5b   :  { %841 = vmatpush.bf16.msra.mxu2 %v1207_v12  ;;  %v1244_v12 = vld [vmem:[#allocation10 + $0xc8] sm:$0xf0] }
  0x5c   :  { %854 = vmatpush.bf16.msra.mxu3 %v1271_v22  ;;  %v1247_v13 = vor.u32 %v1360_v10, %v1244_v12 }
  0x5d   :  { %816 = vmatpush.bf16.msra.mxu0 %v1195_v16  ;;  %v1340_v16 = vld [vmem:[#allocation10 + $0x24] sm:$0xf] }
  0x5e   :  { %829 = vmatpush.bf16.msra.mxu1 %v1259_v29  ;;  %v1167_v21 = vor.u32 %v1340_v16, %v1164_v18  ;;  %v1155_v29 = vor.u32 %v1339_v27, %v1154_v26 }
  0x5f   :  { %842 = vmatpush.bf16.msra.mxu2 %v1199_v20  ;;  %v1359_v20 = vld [vmem:[#allocation10 + $0xb4] sm:$0xf0] }
  0x60   :  { %855 = vmatpush.bf16.msra.mxu3 %v1263_v33  ;;  %v1235_v22 = vor.u32 %v1359_v20, %v1234_v19  ;;  %v1357_v33 = vld [vmem:[#allocation10 + $0xa4] sm:$0xf0] }
  0x61   :  { %817 = vmatpush.bf16.msra.mxu0 %v1187_v32  ;;  %v1226_v32 = vld [vmem:[#allocation10 + $0xa0] sm:$0xf] }
  0x62   :  { %830 = vmatpush.bf16.msra.mxu1 %v1251_v44  ;;  %v1227_v35 = vor.u32 %v1357_v33, %v1226_v32  ;;  %v1218_v44 = vld [vmem:[#allocation10 + $0x90] sm:$0xf] }
  0x63   :  { %843 = vmatpush.bf16.msra.mxu2 %v1191_v36  ;;  %v1228_v36 = vld [vmem:[#allocation10 + $0xa8] sm:$0xf0] }
  0x64   :  { %856 = vmatpush.bf16.msra.mxu3 %v1255_v45  ;;  %v1231_v37 = vor.u32 %v1356_v34, %v1228_v36  ;;  %v1355_v45 = vld [vmem:[#allocation10 + $0x94] sm:$0xf0] }
  0x65   :  { %818 = vmatpush.bf16.msra.mxu0 %v1179_v46  ;;  %v1219_v46 = vor.u32 %v1355_v45, %v1218_v44 }
  0x66   :  { %831 = vmatpush.bf16.msra.mxu1 %v1243_v11  ;;  %v649_v11 = vld [vmem:[%s1606_s6] sm:$0x3] }
  0x67   :  { %844 = vmatpush.bf16.msra.mxu2 %v1183_v47  ;;  %v1354_v47 = vld [vmem:[#allocation10 + $0x94] sm:$0xf]  ;;  %v652_v18 = vperm.slane %v649_v11, 1 }
  0x68   :  { %857 = vmatpush.bf16.msra.mxu3 %v1247_v13  ;;  %v1223_v49 = vor.u32 %v1354_v47, %v1220_v48  ;;  %v651_v13 = vperm.slane %v649_v11, 0 }
  0x69   :  { %819 = vmatpush.bf16.msra.mxu0 %v1171_v53 }
  0x6a   :  { %832 = vmatpush.bf16.msra.mxu1 %v1235_v22 }
  0x6b   :  { %845 = vmatpush.bf16.msra.mxu2 %v1175_v55 }
  0x6c   :  { %858 = vmatpush.bf16.msra.mxu3 %v1239_v25 }
  0x6d   :  { %820 = vmatpush.bf16.msra.mxu0 %v1163_v17 }
  0x6e   :  { %833 = vmatpush.bf16.msra.mxu1 %v1227_v35 }
  0x6f   :  { %846 = vmatpush.bf16.msra.mxu2 %v1167_v21 }
  0x70   :  { %859 = vmatpush.bf16.msra.mxu3 %v1231_v37 }
  0x71   :  { %821 = vmatpush.bf16.msra.mxu0 %v1155_v29 }
  0x72   :  { %834 = vmatpush.bf16.msra.mxu1 %v1219_v46 }
  0x73   :  { %847 = vmatpush.bf16.msra.mxu2 %v1159_v31 }
  0x74   :  { %860 = vmatpush.bf16.msra.mxu3 %v1223_v49 }
  0x75   :  { %822 = vmatpush.bf16.msra.mxu0 %v1147_v41 }
  0x77   :  { %848 = vmatpush.bf16.msra.mxu2 %v1151_v43 }
  0xb5   :  { %v316_v54 = vpop.f32.mrf.mxu0 }
  0xb6   :  { %v317_v56 = vadd.f32 %v316_v54, %v136_v50  ;;  %v329_v57 = vpop.f32.mrf.mxu1  ;;  %v1210_v50 = vld [vmem:[#allocation10 + $0x80] sm:$0xf]  ;;  %v1212_v54 = vld [vmem:[#allocation10 + $0x88] sm:$0xf0] }
  0xb7   :  { %v1211_v53 = vor.u32 %v1353_v51, %v1210_v50  ;;  %v1215_v55 = vor.u32 %v1352_v52, %v1212_v54 }
  0xb8   :  { %v330_v58 = vadd.f32 %v329_v57, %v317_v56  ;;  %v395_v56 = vld [vmem:[%s1604_s4] sm:$0x3] }
  0xb9   :  { %835 = vmatpush.bf16.msra.mxu1 %v1211_v53  ;;  %861 = vmatpush.bf16.msra.mxu3 %v1215_v55  ;;  %v397_v57 = vperm.slane %v395_v56, 0 }
  0xba   :  { %v359_v60 = vmax.f32 %v330_v58, 0.0 }
  0xbc   :  { %v361_v61 = vpack.c.bf16 %v359_v60, %v359_v60  ;;  %v398_v60 = vperm.slane %v395_v56, 1 }
  0xbd   :  { %v342_v62 = vpop.f32.mrf.mxu2  ;;  %v318_v1 = vpop.f32.mrf.mxu0 }
  0xbe   :  { %v343_v63 = vadd.f32 %v342_v62, %v137_v59  ;;  %v355_v0 = vpop.f32.mrf.mxu3  ;;  %v331_v2 = vpop.f32.mrf.mxu1  ;;  %569 = vmatmul.bf16.vlgmr.msrb.gmra.mxu0 %v361_v61  ;;  %595 = vmatmul.bf16.vlgmr.msrb.gmra.mxu2 %v361_v61 }
  0xc0   :  { %v356_v3 = vadd.f32 %v355_v0, %v343_v63 }
  0xc2   :  { %v360_v4 = vmax.f32 %v356_v3, 0.0 }
  0xc4   :  { %v362_v5 = vpack.c.bf16 %v360_v4, %v360_v4 }
  0xc5   :  { %v344_v6 = vpop.f32.mrf.mxu2 }
  0xc6   :  { %v357_v7 = vpop.f32.mrf.mxu3  ;;  %582 = vmatmul.bf16.vlgmr.msrb.gmra.mxu1 %v362_v5  ;;  %608 = vmatmul.bf16.vlgmr.msrb.gmra.mxu3 %v362_v5 }
 0x13b   :  { %v570_v58 = vpop.f32.mrf.mxu0 }
 0x13c   :  { %v571_v59 = vadd.f32 %v570_v58, %v397_v57 }
 0x141   :  { %v596_v61 = vpop.f32.mrf.mxu2 }
 0x142   :  { %v597_v2 = vadd.f32 %v596_v61, %v398_v60 }
 0x143   :  { %v583_v62 = vpop.f32.mrf.mxu1  ;;  %v572_v0 = vpop.f32.mrf.mxu0 }
 0x144   :  { %v584_v63 = vadd.f32 %v583_v62, %v571_v59 }
 0x146   :  { %v613_v1 = vmax.f32 %v584_v63, 0.0 }
 0x148   :  { %v615_v3 = vpack.c.bf16 %v613_v1, %v613_v1 }
 0x149   :  { %v609_v4 = vpop.f32.mrf.mxu3  ;;  %v598_v6 = vpop.f32.mrf.mxu2 }
 0x14a   :  { %v610_v5 = vadd.f32 %v609_v4, %v597_v2  ;;  %823 = vmatmul.bf16.vlgmr.msra.gmra.mxu0 %v615_v3  ;;  %849 = vmatmul.bf16.vlgmr.msra.gmra.mxu2 %v615_v3 }
 0x14b   :  { %v585_v7 = vpop.f32.mrf.mxu1 }
 0x14c   :  { %v614_v8 = vmax.f32 %v610_v5, 0.0 }
 0x14e   :  { %v616_v9 = vpack.c.bf16 %v614_v8, %v614_v8 }
 0x150   :  { %836 = vmatmul.bf16.vlgmr.msra.gmra.mxu1 %v616_v9  ;;  %862 = vmatmul.bf16.vlgmr.msra.gmra.mxu3 %v616_v9 }
 0x151   :  { %v611_v10 = vpop.f32.mrf.mxu3 }
 0x1c7   :  { %v824_v12 = vpop.f32.mrf.mxu0 }
 0x1c8   :  { %v825_v14 = vadd.f32 %v824_v12, %v651_v13 }
 0x1cd   :  { %v837_v15 = vpop.f32.mrf.mxu1  ;;  %v850_v16 = vpop.f32.mrf.mxu2 }
 0x1ce   :  { %v838_v17 = vadd.f32 %v837_v15, %v825_v14  ;;  %v851_v20 = vadd.f32 %v850_v16, %v652_v18 }
 0x1cf   :  { %v826_v19 = vpop.f32.mrf.mxu0 }
 0x1d0   :  { %867 = vst [vmem:[#allocation11] sm:$0xff] %v838_v17 }
 0x1d3   :  { %v863_v21 = vpop.f32.mrf.mxu3 }
 0x1d4   :  { %v864_v22 = vadd.f32 %v863_v21, %v851_v20 }
 0x1d5   :  { %v839_v23 = vpop.f32.mrf.mxu1  ;;  %v852_v24 = vpop.f32.mrf.mxu2 }
 0x1d6   :  { %868 = vst [vmem:[#allocation11 + $0x8] sm:$0xff] %v864_v22 }
 0x1d7   :  { %879 = dma.vmem_to_hbm [thread:$0]  %s875_s27, 256, %s877_s30, [#allocation4]  }
 0x1db   :  { %v865_v25 = vpop.f32.mrf.mxu3 }
 0x1dc   :  { %1526 = dma.done.wait [#allocation4], 256  }
 0x1dd   :  { %1527 = vsyncadd [#allocation4], 4294967040 }
 0x1de   :  { %884 = vsyncpa [#allocation3], 1 }
 0x1df   :  { %885 = vsyncpa [#allocation6], 1 }
 0x1e0   :  { %886 = vsyncpa [#allocation9], 1 }
 0x1e1   :  { %887 = vsyncpa [#allocation4], 1 }

// kernel: tpu_custom_call.1
= control target key start
LH: loop header
LB: loop body
LE: loop exit
PB: predicated region body
PF: predicated region fallthrough
CT: control target
= control target key end

     0   :  { %12 = vsyncpa [#allocation3], 0  ;;  %s1600_s0 = inlined_call_operand.hbm [shape: bf16[8,256], index: 0, kind: input, shape index: {}]   ;;  %s1601_s1 = inlined_call_operand.hbm [shape: bf16[256,256], index: 1, kind: input, shape index: {}]   ;;  %s1602_s2 = inlined_call_operand.hbm [shape: f32[1,256], index: 2, kind: input, shape index: {}]   ;;  %s1603_s3 = inlined_call_operand.hbm [shape: bf16[256,256], index: 3, kind: input, shape index: {}]   ;;  %s1604_s4 = inlined_call_operand.vmem [shape: f32[1,256], index: 4, kind: input, shape index: {}]   ;;  %s1605_s5 = inlined_call_operand.hbm [shape: bf16[256,256], index: 5, kind: input, shape index: {}]   ;;  %s1606_s6 = inlined_call_operand.vmem [shape: f32[1,256], index: 6, kind: input, shape index: {}]   ;;  %s1607_s7 = inlined_call_operand.hbm [shape: f32[8,256], index: 7, kind: output, shape index: {}]  }
   0x1   :  { %13 = vsyncpa [#allocation6], 0 }
   0x2   :  { %14 = vsyncpa [#allocation9], 0  ;;  %s31_s26 = sshll.u32 %s1601_s1, 4  ;;  %s32_s26 = int_to_ptr.hbm [resolvable:$true] %s31_s26 }
   0x3   :  { %15 = vsyncpa [#allocation4], 0  ;;  %s1528_s27 = smov [#allocation5]   ;;  %s55_s8 = sshll.u32 %s1603_s3, 4  ;;  %s56_s8 = int_to_ptr.hbm [resolvable:$true] %s55_s8 }
   0x4   :  { %s33_s28 = sshll.u32 %s1528_s27, 4  ;;  %s1529_s9 = smov 128   ;;  %s34_s28 = int_to_ptr.vmem [resolvable:$true] %s33_s28 }
   0x5   :  { %s1530_s10 = smov 8   ;;  %s1531_s11 = smov [#allocation8]  }
   0x6   :  { %39 = dma.hbm_to_vmem [thread:$0]  %s32_s26, 4096, %s34_s28, [#allocation6], %s1529_s9, %s1529_s9, %s1530_s10  }
   0x7   :  { %s57_s12 = sshll.u32 %s1531_s11, 4  ;;  %s21_s15 = sshll.u32 %s1600_s0, 4  ;;  %s58_s12 = int_to_ptr.vmem [resolvable:$true] %s57_s12  ;;  %s22_s15 = int_to_ptr.hbm [resolvable:$true] %s21_s15 }
   0x8   :  { %63 = dma.hbm_to_vmem [thread:$0]  %s56_s8, 4096, %s58_s12, [#allocation9], %s1529_s9, %s1529_s9, %s1530_s10  }
   0x9   :  { %s45_s17 = sshll.u32 %s1602_s2, 4  ;;  %s1532_s18 = smov [#allocation2]   ;;  %s46_s17 = int_to_ptr.hbm [resolvable:$true] %s45_s17 }
   0xa   :  { %s23_s19 = sshll.u32 %s1532_s18, 4  ;;  %s1533_s3 = smov [#allocation7]   ;;  %s24_s19 = int_to_ptr.vmem [resolvable:$true] %s23_s19 }
   0xb   :  { %26 = dma.hbm_to_vmem [thread:$0]  %s22_s15, 128, %s24_s19, [#allocation3]  }
   0xc   :  { %s47_s20 = sshll.u32 %s1533_s3, 4  ;;  %s70_s23 = sshll.u32 %s1605_s5, 4  ;;  %s48_s20 = int_to_ptr.vmem [resolvable:$true] %s47_s20  ;;  %s71_s23 = int_to_ptr.hbm [resolvable:$true] %s70_s23 }
   0xd   :  { %50 = dma.hbm_to_vmem [thread:$0]  %s46_s17, 32, %s48_s20, [#allocation6]  }
   0xe   :  { %s1534_s0 = smov [#allocation10]  }
   0xf   :  { %s72_s24 = sshll.u32 %s1534_s0, 4  ;;  %s73_s24 = int_to_ptr.vmem [resolvable:$true] %s72_s24 }
  0x10   :  { %78 = dma.hbm_to_vmem [thread:$0]  %s71_s23, 4096, %s73_s24, [#allocation9], %s1529_s9, %s1529_s9, %s1530_s10  }
  0x11   :  { %1520 = dma.done.wait [#allocation3], 128  }
  0x12   :  { %1521 = vsyncadd [#allocation3], 4294967168 }
  0x13   :  { %1522 = dma.done.wait [#allocation6], 4128  }
  0x14   :  { %1523 = vsyncadd [#allocation6], 4294963168 }
  0x15   :  { %1524 = dma.done.wait [#allocation9], 8192  }
  0x16   :  { %1525 = vsyncadd [#allocation9], 4294959104  ;;  %v946_v0 = vld [vmem:[#allocation5 + $0x70] sm:$0xf]  ;;  %v1287_v1 = vld [vmem:[#allocation5 + $0x74] sm:$0xf0] }
  0x17   :  { %v1010_v2 = vld [vmem:[#allocation5 + $0xf0] sm:$0xf]  ;;  %v947_v3 = vor.u32 %v1287_v1, %v946_v0  ;;  %v1303_v4 = vld [vmem:[#allocation5 + $0xf4] sm:$0xf0]  ;;  %v1286_v5 = vld [vmem:[#allocation5 + $0x74] sm:$0xf] }
  0x18   :  { %v948_v6 = vld [vmem:[#allocation5 + $0x78] sm:$0xf0]  ;;  %v1011_v7 = vor.u32 %v1303_v4, %v1010_v2  ;;  %v1302_v9 = vld [vmem:[#allocation5 + $0xf4] sm:$0xf]  ;;  %v938_v11 = vld [vmem:[#allocation5 + $0x60] sm:$0xf] }
  0x19   :  { %v951_v8 = vor.u32 %v1286_v5, %v948_v6  ;;  %v1012_v10 = vld [vmem:[#allocation5 + $0xf8] sm:$0xf0]  ;;  %307 = vmatpush.bf16.msra.mxu0 %v947_v3  ;;  %v1285_v13 = vld [vmem:[#allocation5 + $0x64] sm:$0xf0]  ;;  %v1002_v14 = vld [vmem:[#allocation5 + $0xe0] sm:$0xf] }
  0x1a   :  { %v1015_v12 = vor.u32 %v1302_v9, %v1012_v10  ;;  %v1301_v15 = vld [vmem:[#allocation5 + $0xe4] sm:$0xf0]  ;;  %320 = vmatpush.bf16.msra.mxu1 %v1011_v7  ;;  %v939_v16 = vor.u32 %v1285_v13, %v938_v11  ;;  %v1284_v18 = vld [vmem:[#allocation5 + $0x64] sm:$0xf]  ;;  %v940_v19 = vld [vmem:[#allocation5 + $0x68] sm:$0xf0] }
  0x1b   :  { %333 = vmatpush.bf16.msra.mxu2 %v951_v8  ;;  %v1003_v17 = vor.u32 %v1301_v15, %v1002_v14  ;;  %v1300_v20 = vld [vmem:[#allocation5 + $0xe4] sm:$0xf]  ;;  %v943_v21 = vor.u32 %v1284_v18, %v940_v19  ;;  %v1004_v22 = vld [vmem:[#allocation5 + $0xe8] sm:$0xf0]  ;;  %v930_v23 = vld [vmem:[#allocation5 + $0x50] sm:$0xf] }
  0x1c   :  { %346 = vmatpush.bf16.msra.mxu3 %v1015_v12  ;;  %v1283_v24 = vld [vmem:[#allocation5 + $0x54] sm:$0xf0]  ;;  %v1007_v25 = vor.u32 %v1300_v20, %v1004_v22  ;;  %v994_v26 = vld [vmem:[#allocation5 + $0xd0] sm:$0xf]  ;;  %v1282_v28 = vld [vmem:[#allocation5 + $0x54] sm:$0xf] }
  0x1d   :  { %v1299_v27 = vld [vmem:[#allocation5 + $0xd4] sm:$0xf0]  ;;  %308 = vmatpush.bf16.msra.mxu0 %v939_v16  ;;  %v931_v29 = vor.u32 %v1283_v24, %v930_v23  ;;  %v932_v30 = vld [vmem:[#allocation5 + $0x58] sm:$0xf0]  ;;  %v1298_v31 = vld [vmem:[#allocation5 + $0xd4] sm:$0xf] }
  0x1e   :  { %v996_v32 = vld [vmem:[#allocation5 + $0xd8] sm:$0xf0]  ;;  %321 = vmatpush.bf16.msra.mxu1 %v1003_v17  ;;  %v995_v33 = vor.u32 %v1299_v27, %v994_v26  ;;  %v935_v34 = vor.u32 %v1282_v28, %v932_v30  ;;  %v922_v35 = vld [vmem:[#allocation5 + $0x40] sm:$0xf]  ;;  %v1281_v36 = vld [vmem:[#allocation5 + $0x44] sm:$0xf0] }
  0x1f   :  { %334 = vmatpush.bf16.msra.mxu2 %v943_v21  ;;  %v986_v37 = vld [vmem:[#allocation5 + $0xc0] sm:$0xf]  ;;  %v999_v38 = vor.u32 %v1298_v31, %v996_v32  ;;  %v1297_v39 = vld [vmem:[#allocation5 + $0xc4] sm:$0xf0]  ;;  %v1280_v40 = vld [vmem:[#allocation5 + $0x44] sm:$0xf]  ;;  %v923_v44 = vor.u32 %v1281_v36, %v922_v35 }
  0x20   :  { %347 = vmatpush.bf16.msra.mxu3 %v1007_v25  ;;  %v924_v41 = vld [vmem:[#allocation5 + $0x48] sm:$0xf0]  ;;  %v1296_v42 = vld [vmem:[#allocation5 + $0xc4] sm:$0xf]  ;;  %v987_v45 = vor.u32 %v1297_v39, %v986_v37  ;;  %v914_v47 = vld [vmem:[#allocation5 + $0x30] sm:$0xf] }
  0x21   :  { %v988_v43 = vld [vmem:[#allocation5 + $0xc8] sm:$0xf0]  ;;  %309 = vmatpush.bf16.msra.mxu0 %v931_v29  ;;  %v927_v46 = vor.u32 %v1280_v40, %v924_v41  ;;  %v1279_v48 = vld [vmem:[#allocation5 + $0x34] sm:$0xf0]  ;;  %v978_v49 = vld [vmem:[#allocation5 + $0xb0] sm:$0xf] }
  0x22   :  { %322 = vmatpush.bf16.msra.mxu1 %v995_v33  ;;  %v991_v50 = vor.u32 %v1296_v42, %v988_v43  ;;  %v1295_v51 = vld [vmem:[#allocation5 + $0xb4] sm:$0xf0]  ;;  %v1278_v52 = vld [vmem:[#allocation5 + $0x34] sm:$0xf]  ;;  %v916_v53 = vld [vmem:[#allocation5 + $0x38] sm:$0xf0]  ;;  %v915_v56 = vor.u32 %v1279_v48, %v914_v47 }
  0x23   :  { %335 = vmatpush.bf16.msra.mxu2 %v935_v34  ;;  %v1294_v54 = vld [vmem:[#allocation5 + $0xb4] sm:$0xf]  ;;  %v980_v55 = vld [vmem:[#allocation5 + $0xb8] sm:$0xf0]  ;;  %v979_v57 = vor.u32 %v1295_v51, %v978_v49  ;;  %v919_v58 = vor.u32 %v1278_v52, %v916_v53  ;;  %v906_v59 = vld [vmem:[#allocation5 + $0x20] sm:$0xf] }
  0x24   :  { %348 = vmatpush.bf16.msra.mxu3 %v999_v38  ;;  %v1277_v60 = vld [vmem:[#allocation5 + $0x24] sm:$0xf0]  ;;  %v970_v61 = vld [vmem:[#allocation5 + $0xa0] sm:$0xf]  ;;  %v983_v62 = vor.u32 %v1294_v54, %v980_v55  ;;  %v1276_v0 = vld [vmem:[#allocation5 + $0x24] sm:$0xf] }
  0x25   :  { %310 = vmatpush.bf16.msra.mxu0 %v923_v44  ;;  %v1293_v63 = vld [vmem:[#allocation5 + $0xa4] sm:$0xf0]  ;;  %v908_v1 = vld [vmem:[#allocation5 + $0x28] sm:$0xf0]  ;;  %v1292_v2 = vld [vmem:[#allocation5 + $0xa4] sm:$0xf]  ;;  %v907_v4 = vor.u32 %v1277_v60, %v906_v59 }
  0x26   :  { %323 = vmatpush.bf16.msra.mxu1 %v987_v45  ;;  %v972_v3 = vld [vmem:[#allocation5 + $0xa8] sm:$0xf0]  ;;  %v971_v5 = vor.u32 %v1293_v63, %v970_v61  ;;  %v911_v6 = vor.u32 %v1276_v0, %v908_v1  ;;  %v898_v7 = vld [vmem:[#allocation5 + $0x10] sm:$0xf]  ;;  %v1275_v8 = vld [vmem:[#allocation5 + $0x14] sm:$0xf0] }
  0x27   :  { %336 = vmatpush.bf16.msra.mxu2 %v927_v46  ;;  %v962_v9 = vld [vmem:[#allocation5 + $0x90] sm:$0xf]  ;;  %v975_v10 = vor.u32 %v1292_v2, %v972_v3  ;;  %v1291_v11 = vld [vmem:[#allocation5 + $0x94] sm:$0xf0]  ;;  %v1274_v12 = vld [vmem:[#allocation5 + $0x14] sm:$0xf]  ;;  %v899_v16 = vor.u32 %v1275_v8, %v898_v7 }
  0x28   :  { %349 = vmatpush.bf16.msra.mxu3 %v991_v50  ;;  %v900_v13 = vld [vmem:[#allocation5 + $0x18] sm:$0xf0]  ;;  %v1290_v14 = vld [vmem:[#allocation5 + $0x94] sm:$0xf]  ;;  %v890_v17 = vld [vmem:[#allocation5] sm:$0xf]  ;;  %v963_v19 = vor.u32 %v1291_v11, %v962_v9 }
  0x29   :  { %311 = vmatpush.bf16.msra.mxu0 %v915_v56  ;;  %v964_v15 = vld [vmem:[#allocation5 + $0x98] sm:$0xf0]  ;;  %v903_v20 = vor.u32 %v1274_v12, %v900_v13  ;;  %v1273_v21 = vld [vmem:[#allocation5 + $0x4] sm:$0xf0]  ;;  %v954_v22 = vld [vmem:[#allocation5 + $0x80] sm:$0xf] }
  0x2a   :  { %324 = vmatpush.bf16.msra.mxu1 %v979_v57  ;;  %v101_v18 = vld [vmem:[#allocation2] sm:$0xff]  ;;  %v1289_v23 = vld [vmem:[#allocation5 + $0x84] sm:$0xf0]  ;;  %v967_v24 = vor.u32 %v1290_v14, %v964_v15  ;;  %v1272_v25 = vld [vmem:[#allocation5 + $0x4] sm:$0xf]  ;;  %v891_v32 = vor.u32 %v1273_v21, %v890_v17  ;;  %s1535_s26 = smov [#allocation11]  }
  0x2b   :  { %337 = vmatpush.bf16.msra.mxu2 %v919_v58  ;;  %v892_v26 = vld [vmem:[#allocation5 + $0x8] sm:$0xf0]  ;;  %v1288_v27 = vld [vmem:[#allocation5 + $0x84] sm:$0xf]  ;;  %v141_v29 = vunpack.c.l.b16 %v101_v18  ;;  %v1074_v30 = vld [vmem:[#allocation8 + $0x70] sm:$0xf]  ;;  %v142_v33 = vunpack.c.h.b16 %v101_v18  ;;  %v955_v36 = vor.u32 %v1289_v23, %v954_v22 }
  0x2c   :  { %350 = vmatpush.bf16.msra.mxu3 %v983_v62  ;;  %v956_v28 = vld [vmem:[#allocation5 + $0x88] sm:$0xf0]  ;;  %v1319_v31 = vld [vmem:[#allocation8 + $0x74] sm:$0xf0]  ;;  %v1318_v34 = vld [vmem:[#allocation8 + $0x74] sm:$0xf]  ;;  %v895_v37 = vor.u32 %v1272_v25, %v892_v26 }
  0x2d   :  { %312 = vmatpush.bf16.msra.mxu0 %v907_v4  ;;  %v1076_v35 = vld [vmem:[#allocation8 + $0x78] sm:$0xf0]  ;;  %v959_v38 = vor.u32 %v1288_v27, %v956_v28  ;;  %v1075_v39 = vor.u32 %v1319_v31, %v1074_v30  ;;  %v1066_v40 = vld [vmem:[#allocation8 + $0x60] sm:$0xf]  ;;  %v1138_v41 = vld [vmem:[#allocation8 + $0xf0] sm:$0xf]  ;;  %v143_v43 = vpack.c.b16 %v141_v29, %v141_v29  ;;  %v144_v48 = vpack.c.b16 %v142_v33, %v142_v33 }
  0x2e   :  { %325 = vmatpush.bf16.msra.mxu1 %v971_v5  ;;  %v1335_v42 = vld [vmem:[#allocation8 + $0xf4] sm:$0xf0]  ;;  %v1079_v44 = vor.u32 %v1318_v34, %v1076_v35  ;;  %v1317_v45 = vld [vmem:[#allocation8 + $0x64] sm:$0xf0]  ;;  %v1334_v46 = vld [vmem:[#allocation8 + $0xf4] sm:$0xf] }
  0x2f   :  { %338 = vmatpush.bf16.msra.mxu2 %v911_v6  ;;  %v1140_v47 = vld [vmem:[#allocation8 + $0xf8] sm:$0xf0]  ;;  %v1316_v49 = vld [vmem:[#allocation8 + $0x64] sm:$0xf]  ;;  %v1068_v50 = vld [vmem:[#allocation8 + $0x68] sm:$0xf0]  ;;  %v1139_v51 = vor.u32 %v1335_v42, %v1138_v41  ;;  %v1067_v52 = vor.u32 %v1317_v45, %v1066_v40 }
  0x30   :  { %351 = vmatpush.bf16.msra.mxu3 %v975_v10  ;;  %v1143_v53 = vor.u32 %v1334_v46, %v1140_v47  ;;  %v1058_v54 = vld [vmem:[#allocation8 + $0x50] sm:$0xf]  ;;  %v1130_v55 = vld [vmem:[#allocation8 + $0xe0] sm:$0xf]  ;;  %v1333_v56 = vld [vmem:[#allocation8 + $0xe4] sm:$0xf0]  ;;  %v1071_v57 = vor.u32 %v1316_v49, %v1068_v50 }
  0x31   :  { %313 = vmatpush.bf16.msra.mxu0 %v899_v16  ;;  %v1315_v58 = vld [vmem:[#allocation8 + $0x54] sm:$0xf0]  ;;  %v1332_v59 = vld [vmem:[#allocation8 + $0xe4] sm:$0xf]  ;;  %v1132_v60 = vld [vmem:[#allocation8 + $0xe8] sm:$0xf0]  ;;  %v1131_v63 = vor.u32 %v1333_v56, %v1130_v55 }
  0x32   :  { %326 = vmatpush.bf16.msra.mxu1 %v963_v19  ;;  %v1314_v61 = vld [vmem:[#allocation8 + $0x54] sm:$0xf]  ;;  %v1060_v62 = vld [vmem:[#allocation8 + $0x58] sm:$0xf0]  ;;  %v1059_v0 = vor.u32 %v1315_v58, %v1058_v54  ;;  %v1135_v1 = vor.u32 %v1332_v59, %v1132_v60  ;;  %v1050_v2 = vld [vmem:[#allocation8 + $0x40] sm:$0xf] }
  0x33   :  { %339 = vmatpush.bf16.msra.mxu2 %v903_v20  ;;  %v1122_v3 = vld [vmem:[#allocation8 + $0xd0] sm:$0xf]  ;;  %v1331_v4 = vld [vmem:[#allocation8 + $0xd4] sm:$0xf0]  ;;  %v1063_v5 = vor.u32 %v1314_v61, %v1060_v62  ;;  %v1313_v6 = vld [vmem:[#allocation8 + $0x44] sm:$0xf0] }
  0x34   :  { %352 = vmatpush.bf16.msra.mxu3 %v967_v24  ;;  %v1330_v7 = vld [vmem:[#allocation8 + $0xd4] sm:$0xf]  ;;  %v1124_v8 = vld [vmem:[#allocation8 + $0xd8] sm:$0xf0]  ;;  %v1312_v9 = vld [vmem:[#allocation8 + $0x44] sm:$0xf]  ;;  %v1123_v11 = vor.u32 %v1331_v4, %v1122_v3  ;;  %v1051_v12 = vor.u32 %v1313_v6, %v1050_v2 }
  0x35   :  { %314 = vmatpush.bf16.msra.mxu0 %v891_v32  ;;  %v1052_v10 = vld [vmem:[#allocation8 + $0x48] sm:$0xf0]  ;;  %v1127_v13 = vor.u32 %v1330_v7, %v1124_v8  ;;  %v1042_v14 = vld [vmem:[#allocation8 + $0x30] sm:$0xf]  ;;  %v1114_v15 = vld [vmem:[#allocation8 + $0xc0] sm:$0xf] }
  0x36   :  { %327 = vmatpush.bf16.msra.mxu1 %v955_v36  ;;  %v1329_v16 = vld [vmem:[#allocation8 + $0xc4] sm:$0xf0]  ;;  %v1055_v17 = vor.u32 %v1312_v9, %v1052_v10  ;;  %v1311_v18 = vld [vmem:[#allocation8 + $0x34] sm:$0xf0]  ;;  %v1328_v19 = vld [vmem:[#allocation8 + $0xc4] sm:$0xf] }
  0x37   :  { %340 = vmatpush.bf16.msra.mxu2 %v895_v37  ;;  %v1116_v20 = vld [vmem:[#allocation8 + $0xc8] sm:$0xf0]  ;;  %v1310_v21 = vld [vmem:[#allocation8 + $0x34] sm:$0xf]  ;;  %v1044_v22 = vld [vmem:[#allocation8 + $0x38] sm:$0xf0]  ;;  %v1115_v23 = vor.u32 %v1329_v16, %v1114_v15  ;;  %v1043_v24 = vor.u32 %v1311_v18, %v1042_v14 }
  0x38   :  { %353 = vmatpush.bf16.msra.mxu3 %v959_v38  ;;  %315 = vmatmul.bf16.vlgmr.msra.gmra.mxu0 %v143_v43  ;;  %v1119_v25 = vor.u32 %v1328_v19, %v1116_v20  ;;  %v1047_v26 = vor.u32 %v1310_v21, %v1044_v22  ;;  %v1034_v27 = vld [vmem:[#allocation8 + $0x20] sm:$0xf]  ;;  %v1309_v28 = vld [vmem:[#allocation8 + $0x24] sm:$0xf0]  ;;  %v1308_v29 = vld [vmem:[#allocation8 + $0x24] sm:$0xf] }
  0x39   :  { %561 = vmatpush.bf16.msrb.mxu0 %v1075_v39  ;;  %328 = vmatmul.bf16.vlgmr.msra.gmra.mxu1 %v144_v48  ;;  %v1036_v30 = vld [vmem:[#allocation8 + $0x28] sm:$0xf0]  ;;  %v1035_v31 = vor.u32 %v1309_v28, %v1034_v27  ;;  %v1106_v33 = vld [vmem:[#allocation8 + $0xb0] sm:$0xf]  ;;  %v1327_v34 = vld [vmem:[#allocation8 + $0xb4] sm:$0xf0] }
  0x3a   :  { %341 = vmatmul.bf16.vlgmr.msra.gmra.mxu2 %v143_v43  ;;  %574 = vmatpush.bf16.msrb.mxu1 %v1139_v51  ;;  %v1039_v32 = vor.u32 %v1308_v29, %v1036_v30  ;;  %v1326_v35 = vld [vmem:[#allocation8 + $0xb4] sm:$0xf]  ;;  %v1107_v36 = vor.u32 %v1327_v34, %v1106_v33  ;;  %v1108_v37 = vld [vmem:[#allocation8 + $0xb8] sm:$0xf0]  ;;  %v1026_v39 = vld [vmem:[#allocation8 + $0x10] sm:$0xf] }
  0x3b   :  { %587 = vmatpush.bf16.msrb.mxu2 %v1079_v44  ;;  %354 = vmatmul.bf16.vlgmr.msra.gmra.mxu3 %v144_v48  ;;  %v1111_v38 = vor.u32 %v1326_v35, %v1108_v37  ;;  %v1307_v40 = vld [vmem:[#allocation8 + $0x14] sm:$0xf0]  ;;  %v1306_v41 = vld [vmem:[#allocation8 + $0x14] sm:$0xf]  ;;  %v1028_v43 = vld [vmem:[#allocation8 + $0x18] sm:$0xf0] }
  0x3c   :  { %600 = vmatpush.bf16.msrb.mxu3 %v1143_v53  ;;  %v1027_v42 = vor.u32 %v1307_v40, %v1026_v39  ;;  %v1031_v44 = vor.u32 %v1306_v41, %v1028_v43  ;;  %v1098_v45 = vld [vmem:[#allocation8 + $0xa0] sm:$0xf]  ;;  %v1325_v46 = vld [vmem:[#allocation8 + $0xa4] sm:$0xf0]  ;;  %v1324_v47 = vld [vmem:[#allocation8 + $0xa4] sm:$0xf] }
  0x3d   :  { %562 = vmatpush.bf16.msrb.mxu0 %v1067_v52  ;;  %v1099_v48 = vor.u32 %v1325_v46, %v1098_v45  ;;  %v1100_v49 = vld [vmem:[#allocation8 + $0xa8] sm:$0xf0]  ;;  %v1018_v51 = vld [vmem:[#allocation8] sm:$0xf]  ;;  %v1305_v52 = vld [vmem:[#allocation8 + $0x4] sm:$0xf0] }
  0x3e   :  { %575 = vmatpush.bf16.msrb.mxu1 %v1131_v63  ;;  %v1103_v50 = vor.u32 %v1324_v47, %v1100_v49  ;;  %v1304_v53 = vld [vmem:[#allocation8 + $0x4] sm:$0xf]  ;;  %v1019_v54 = vor.u32 %v1305_v52, %v1018_v51  ;;  %v1020_v55 = vld [vmem:[#allocation8 + $0x8] sm:$0xf0]  ;;  %v1323_v58 = vld [vmem:[#allocation8 + $0x94] sm:$0xf0] }
  0x3f   :  { %588 = vmatpush.bf16.msrb.mxu2 %v1071_v57  ;;  %v1023_v56 = vor.u32 %v1304_v53, %v1020_v55  ;;  %v1090_v57 = vld [vmem:[#allocation8 + $0x90] sm:$0xf]  ;;  %v1322_v60 = vld [vmem:[#allocation8 + $0x94] sm:$0xf]  ;;  %v1092_v61 = vld [vmem:[#allocation8 + $0x98] sm:$0xf0] }
  0x40   :  { %601 = vmatpush.bf16.msrb.mxu3 %v1135_v1  ;;  %v1091_v59 = vor.u32 %v1323_v58, %v1090_v57  ;;  %v1095_v62 = vor.u32 %v1322_v60, %v1092_v61  ;;  %v1082_v63 = vld [vmem:[#allocation8 + $0x80] sm:$0xf]  ;;  %v1320_v1 = vld [vmem:[#allocation8 + $0x84] sm:$0xf]  ;;  %v1084_v3 = vld [vmem:[#allocation8 + $0x88] sm:$0xf0] }
  0x41   :  { %563 = vmatpush.bf16.msrb.mxu0 %v1059_v0  ;;  %v1321_v0 = vld [vmem:[#allocation8 + $0x84] sm:$0xf0]  ;;  %v1087_v4 = vor.u32 %v1320_v1, %v1084_v3  ;;  %v1351_v6 = vld [vmem:[#allocation10 + $0x74] sm:$0xf0]  ;;  %v1350_v7 = vld [vmem:[#allocation10 + $0x74] sm:$0xf] }
  0x42   :  { %576 = vmatpush.bf16.msrb.mxu1 %v1123_v11  ;;  %v1083_v2 = vor.u32 %v1321_v0, %v1082_v63  ;;  %v1204_v9 = vld [vmem:[#allocation10 + $0x78] sm:$0xf0]  ;;  %v1194_v10 = vld [vmem:[#allocation10 + $0x60] sm:$0xf]  ;;  %v1349_v11 = vld [vmem:[#allocation10 + $0x64] sm:$0xf0] }
  0x43   :  { %589 = vmatpush.bf16.msrb.mxu2 %v1063_v5  ;;  %v1202_v5 = vld [vmem:[#allocation10 + $0x70] sm:$0xf]  ;;  %v1196_v14 = vld [vmem:[#allocation10 + $0x68] sm:$0xf0]  ;;  %v1195_v16 = vor.u32 %v1349_v11, %v1194_v10  ;;  %v1366_v18 = vld [vmem:[#allocation10 + $0xf4] sm:$0xf] }
  0x44   :  { %602 = vmatpush.bf16.msrb.mxu3 %v1127_v13  ;;  %v1203_v8 = vor.u32 %v1351_v6, %v1202_v5  ;;  %v1348_v13 = vld [vmem:[#allocation10 + $0x64] sm:$0xf]  ;;  %v1266_v15 = vld [vmem:[#allocation10 + $0xf0] sm:$0xf]  ;;  %v1268_v19 = vld [vmem:[#allocation10 + $0xf8] sm:$0xf0] }
  0x45   :  { %564 = vmatpush.bf16.msrb.mxu0 %v1051_v12  ;;  %v1207_v12 = vor.u32 %v1350_v7, %v1204_v9  ;;  %v1199_v20 = vor.u32 %v1348_v13, %v1196_v14  ;;  %v1271_v22 = vor.u32 %v1366_v18, %v1268_v19  ;;  %v1258_v27 = vld [vmem:[#allocation10 + $0xe0] sm:$0xf]  ;;  %v1365_v28 = vld [vmem:[#allocation10 + $0xe4] sm:$0xf0]  ;;  %v1364_v30 = vld [vmem:[#allocation10 + $0xe4] sm:$0xf] }
  0x46   :  { %577 = vmatpush.bf16.msrb.mxu1 %v1115_v23  ;;  %v1186_v23 = vld [vmem:[#allocation10 + $0x50] sm:$0xf]  ;;  %v1259_v29 = vor.u32 %v1365_v28, %v1258_v27  ;;  %v1178_v34 = vld [vmem:[#allocation10 + $0x40] sm:$0xf]  ;;  %v1345_v35 = vld [vmem:[#allocation10 + $0x44] sm:$0xf0] }
  0x47   :  { %590 = vmatpush.bf16.msrb.mxu2 %v1055_v17  ;;  %v1367_v17 = vld [vmem:[#allocation10 + $0xf4] sm:$0xf0]  ;;  %v1250_v37 = vld [vmem:[#allocation10 + $0xd0] sm:$0xf]  ;;  %v1362_v39 = vld [vmem:[#allocation10 + $0xd4] sm:$0xf]  ;;  %v1179_v46 = vor.u32 %v1345_v35, %v1178_v34 }
  0x48   :  { %603 = vmatpush.bf16.msrb.mxu3 %v1119_v25  ;;  %v1267_v21 = vor.u32 %v1367_v17, %v1266_v15  ;;  %v1346_v25 = vld [vmem:[#allocation10 + $0x54] sm:$0xf]  ;;  %v1344_v40 = vld [vmem:[#allocation10 + $0x44] sm:$0xf]  ;;  %v1180_v41 = vld [vmem:[#allocation10 + $0x48] sm:$0xf0] }
  0x49   :  { %565 = vmatpush.bf16.msrb.mxu0 %v1043_v24  ;;  %v1347_v24 = vld [vmem:[#allocation10 + $0x54] sm:$0xf0]  ;;  %v134_v43 = vld [vmem:[#allocation7] sm:$0x3]  ;;  %v1183_v47 = vor.u32 %v1344_v40, %v1180_v41  ;;  %v1342_v51 = vld [vmem:[#allocation10 + $0x34] sm:$0xf] }
  0x4a   :  { %578 = vmatpush.bf16.msrb.mxu1 %v1107_v36  ;;  %v1343_v49 = vld [vmem:[#allocation10 + $0x34] sm:$0xf0]  ;;  %v1172_v52 = vld [vmem:[#allocation10 + $0x38] sm:$0xf0]  ;;  %v1361_v9 = vld [vmem:[#allocation10 + $0xc4] sm:$0xf0] }
  0x4b   :  { %591 = vmatpush.bf16.msrb.mxu2 %v1047_v26  ;;  %v1188_v26 = vld [vmem:[#allocation10 + $0x58] sm:$0xf0]  ;;  %v1175_v55 = vor.u32 %v1342_v51, %v1172_v52  ;;  %v1360_v10 = vld [vmem:[#allocation10 + $0xc4] sm:$0xf]  ;;  %v1162_v14 = vld [vmem:[#allocation10 + $0x20] sm:$0xf] }
  0x4c   :  { %604 = vmatpush.bf16.msrb.mxu3 %v1111_v38  ;;  %v1191_v36 = vor.u32 %v1346_v25, %v1188_v26  ;;  %v1363_v38 = vld [vmem:[#allocation10 + $0xd4] sm:$0xf0]  ;;  %v1341_v15 = vld [vmem:[#allocation10 + $0x24] sm:$0xf0]  ;;  %v1164_v18 = vld [vmem:[#allocation10 + $0x28] sm:$0xf0] }
  0x4d   :  { %566 = vmatpush.bf16.msrb.mxu0 %v1035_v31  ;;  %v1260_v31 = vld [vmem:[#allocation10 + $0xe8] sm:$0xf0]  ;;  %v1163_v17 = vor.u32 %v1341_v15, %v1162_v14  ;;  %v1234_v19 = vld [vmem:[#allocation10 + $0xb0] sm:$0xf]  ;;  %v1339_v27 = vld [vmem:[#allocation10 + $0x14] sm:$0xf0] }
  0x4e   :  { %579 = vmatpush.bf16.msrb.mxu1 %v1099_v48  ;;  %v1263_v33 = vor.u32 %v1364_v30, %v1260_v31  ;;  %v1170_v48 = vld [vmem:[#allocation10 + $0x30] sm:$0xf]  ;;  %v1338_v28 = vld [vmem:[#allocation10 + $0x14] sm:$0xf]  ;;  %v1156_v30 = vld [vmem:[#allocation10 + $0x18] sm:$0xf0] }
  0x4f   :  { %592 = vmatpush.bf16.msrb.mxu2 %v1039_v32  ;;  %v1187_v32 = vor.u32 %v1347_v24, %v1186_v23  ;;  %v1171_v53 = vor.u32 %v1343_v49, %v1170_v48  ;;  %v1358_v23 = vld [vmem:[#allocation10 + $0xb4] sm:$0xf]  ;;  %v1236_v24 = vld [vmem:[#allocation10 + $0xb8] sm:$0xf0]  ;;  %v1154_v26 = vld [vmem:[#allocation10 + $0x10] sm:$0xf]  ;;  %v1159_v31 = vor.u32 %v1338_v28, %v1156_v30 }
  0x50   :  { %605 = vmatpush.bf16.msrb.mxu3 %v1103_v50  ;;  %v136_v50 = vperm.slane %v134_v43, 0  ;;  %v1239_v25 = vor.u32 %v1358_v23, %v1236_v24  ;;  %v1356_v34 = vld [vmem:[#allocation10 + $0xa4] sm:$0xf]  ;;  %v1220_v48 = vld [vmem:[#allocation10 + $0x98] sm:$0xf0]  ;;  %s874_s27 = sshll.u32 %s1535_s26, 4  ;;  %s875_s27 = int_to_ptr.vmem [resolvable:$true] %s874_s27 }
  0x51   :  { %567 = vmatpush.bf16.msrb.mxu0 %v1027_v42  ;;  %v1252_v42 = vld [vmem:[#allocation10 + $0xd8] sm:$0xf0]  ;;  %v1336_v40 = vld [vmem:[#allocation10 + $0x4] sm:$0xf]  ;;  %v1353_v51 = vld [vmem:[#allocation10 + $0x84] sm:$0xf0] }
  0x52   :  { %580 = vmatpush.bf16.msrb.mxu1 %v1091_v59  ;;  %v1255_v45 = vor.u32 %v1362_v39, %v1252_v42  ;;  %v137_v59 = vperm.slane %v134_v43, 1  ;;  %v1337_v39 = vld [vmem:[#allocation10 + $0x4] sm:$0xf0]  ;;  %v1148_v42 = vld [vmem:[#allocation10 + $0x8] sm:$0xf0]  ;;  %s876_s30 = sshll.u32 %s1607_s7, 4  ;;  %s877_s30 = int_to_ptr.hbm [resolvable:$true] %s876_s30 }
  0x53   :  { %593 = vmatpush.bf16.msrb.mxu2 %v1031_v44  ;;  %v1251_v44 = vor.u32 %v1363_v38, %v1250_v37  ;;  %v1146_v38 = vld [vmem:[#allocation10] sm:$0xf]  ;;  %v1151_v43 = vor.u32 %v1336_v40, %v1148_v42  ;;  %v1352_v52 = vld [vmem:[#allocation10 + $0x84] sm:$0xf] }
  0x54   :  { %606 = vmatpush.bf16.msrb.mxu3 %v1095_v62  ;;  %v1147_v41 = vor.u32 %v1337_v39, %v1146_v38 }
  0x55   :  { %568 = vmatpush.bf16.msrb.mxu0 %v1019_v54 }
  0x56   :  { %581 = vmatpush.bf16.msrb.mxu1 %v1083_v2 }
  0x57   :  { %594 = vmatpush.bf16.msrb.mxu2 %v1023_v56 }
  0x58   :  { %607 = vmatpush.bf16.msrb.mxu3 %v1087_v4 }
  0x59   :  { %815 = vmatpush.bf16.msra.mxu0 %v1203_v8  ;;  %v1242_v8 = vld [vmem:[#allocation10 + $0xc0] sm:$0xf] }
  0x5a   :  { %828 = vmatpush.bf16.msra.mxu1 %v1267_v21  ;;  %v1243_v11 = vor.u32 %v1361_v9, %v1242_v8 }
  0x5b   :  { %841 = vmatpush.bf16.msra.mxu2 %v1207_v12  ;;  %v1244_v12 = vld [vmem:[#allocation10 + $0xc8] sm:$0xf0] }
  0x5c   :  { %854 = vmatpush.bf16.msra.mxu3 %v1271_v22  ;;  %v1247_v13 = vor.u32 %v1360_v10, %v1244_v12 }
  0x5d   :  { %816 = vmatpush.bf16.msra.mxu0 %v1195_v16  ;;  %v1340_v16 = vld [vmem:[#allocation10 + $0x24] sm:$0xf] }
  0x5e   :  { %829 = vmatpush.bf16.msra.mxu1 %v1259_v29  ;;  %v1167_v21 = vor.u32 %v1340_v16, %v1164_v18  ;;  %v1155_v29 = vor.u32 %v1339_v27, %v1154_v26 }
  0x5f   :  { %842 = vmatpush.bf16.msra.mxu2 %v1199_v20  ;;  %v1359_v20 = vld [vmem:[#allocation10 + $0xb4] sm:$0xf0] }
  0x60   :  { %855 = vmatpush.bf16.msra.mxu3 %v1263_v33  ;;  %v1235_v22 = vor.u32 %v1359_v20, %v1234_v19  ;;  %v1357_v33 = vld [vmem:[#allocation10 + $0xa4] sm:$0xf0] }
  0x61   :  { %817 = vmatpush.bf16.msra.mxu0 %v1187_v32  ;;  %v1226_v32 = vld [vmem:[#allocation10 + $0xa0] sm:$0xf] }
  0x62   :  { %830 = vmatpush.bf16.msra.mxu1 %v1251_v44  ;;  %v1227_v35 = vor.u32 %v1357_v33, %v1226_v32  ;;  %v1218_v44 = vld [vmem:[#allocation10 + $0x90] sm:$0xf] }
  0x63   :  { %843 = vmatpush.bf16.msra.mxu2 %v1191_v36  ;;  %v1228_v36 = vld [vmem:[#allocation10 + $0xa8] sm:$0xf0] }
  0x64   :  { %856 = vmatpush.bf16.msra.mxu3 %v1255_v45  ;;  %v1231_v37 = vor.u32 %v1356_v34, %v1228_v36  ;;  %v1355_v45 = vld [vmem:[#allocation10 + $0x94] sm:$0xf0] }
  0x65   :  { %818 = vmatpush.bf16.msra.mxu0 %v1179_v46  ;;  %v1219_v46 = vor.u32 %v1355_v45, %v1218_v44 }
  0x66   :  { %831 = vmatpush.bf16.msra.mxu1 %v1243_v11  ;;  %v649_v11 = vld [vmem:[%s1606_s6] sm:$0x3] }
  0x67   :  { %844 = vmatpush.bf16.msra.mxu2 %v1183_v47  ;;  %v1354_v47 = vld [vmem:[#allocation10 + $0x94] sm:$0xf]  ;;  %v652_v18 = vperm.slane %v649_v11, 1 }
  0x68   :  { %857 = vmatpush.bf16.msra.mxu3 %v1247_v13  ;;  %v1223_v49 = vor.u32 %v1354_v47, %v1220_v48  ;;  %v651_v13 = vperm.slane %v649_v11, 0 }
  0x69   :  { %819 = vmatpush.bf16.msra.mxu0 %v1171_v53 }
  0x6a   :  { %832 = vmatpush.bf16.msra.mxu1 %v1235_v22 }
  0x6b   :  { %845 = vmatpush.bf16.msra.mxu2 %v1175_v55 }
  0x6c   :  { %858 = vmatpush.bf16.msra.mxu3 %v1239_v25 }
  0x6d   :  { %820 = vmatpush.bf16.msra.mxu0 %v1163_v17 }
  0x6e   :  { %833 = vmatpush.bf16.msra.mxu1 %v1227_v35 }
  0x6f   :  { %846 = vmatpush.bf16.msra.mxu2 %v1167_v21 }
  0x70   :  { %859 = vmatpush.bf16.msra.mxu3 %v1231_v37 }
  0x71   :  { %821 = vmatpush.bf16.msra.mxu0 %v1155_v29 }
  0x72   :  { %834 = vmatpush.bf16.msra.mxu1 %v1219_v46 }
  0x73   :  { %847 = vmatpush.bf16.msra.mxu2 %v1159_v31 }
  0x74   :  { %860 = vmatpush.bf16.msra.mxu3 %v1223_v49 }
  0x75   :  { %822 = vmatpush.bf16.msra.mxu0 %v1147_v41 }
  0x77   :  { %848 = vmatpush.bf16.msra.mxu2 %v1151_v43 }
  0xb5   :  { %v316_v54 = vpop.f32.mrf.mxu0 }
  0xb6   :  { %v317_v56 = vadd.f32 %v316_v54, %v136_v50  ;;  %v329_v57 = vpop.f32.mrf.mxu1  ;;  %v1210_v50 = vld [vmem:[#allocation10 + $0x80] sm:$0xf]  ;;  %v1212_v54 = vld [vmem:[#allocation10 + $0x88] sm:$0xf0] }
  0xb7   :  { %v1211_v53 = vor.u32 %v1353_v51, %v1210_v50  ;;  %v1215_v55 = vor.u32 %v1352_v52, %v1212_v54 }
  0xb8   :  { %v330_v58 = vadd.f32 %v329_v57, %v317_v56  ;;  %v395_v56 = vld [vmem:[%s1604_s4] sm:$0x3] }
  0xb9   :  { %835 = vmatpush.bf16.msra.mxu1 %v1211_v53  ;;  %861 = vmatpush.bf16.msra.mxu3 %v1215_v55  ;;  %v397_v57 = vperm.slane %v395_v56, 0 }
  0xba   :  { %v359_v60 = vmax.f32 %v330_v58, 0.0 }
  0xbc   :  { %v361_v61 = vpack.c.bf16 %v359_v60, %v359_v60  ;;  %v398_v60 = vperm.slane %v395_v56, 1 }
  0xbd   :  { %v342_v62 = vpop.f32.mrf.mxu2  ;;  %v318_v1 = vpop.f32.mrf.mxu0 }
  0xbe   :  { %v343_v63 = vadd.f32 %v342_v62, %v137_v59  ;;  %v355_v0 = vpop.f32.mrf.mxu3  ;;  %v331_v2 = vpop.f32.mrf.mxu1  ;;  %569 = vmatmul.bf16.vlgmr.msrb.gmra.mxu0 %v361_v61  ;;  %595 = vmatmul.bf16.vlgmr.msrb.gmra.mxu2 %v361_v61 }
  0xc0   :  { %v356_v3 = vadd.f32 %v355_v0, %v343_v63 }
  0xc2   :  { %v360_v4 = vmax.f32 %v356_v3, 0.0 }
  0xc4   :  { %v362_v5 = vpack.c.bf16 %v360_v4, %v360_v4 }
  0xc5   :  { %v344_v6 = vpop.f32.mrf.mxu2 }
  0xc6   :  { %v357_v7 = vpop.f32.mrf.mxu3  ;;  %582 = vmatmul.bf16.vlgmr.msrb.gmra.mxu1 %v362_v5  ;;  %608 = vmatmul.bf16.vlgmr.msrb.gmra.mxu3 %v362_v5 }
 0x13b   :  { %v570_v58 = vpop.f32.mrf.mxu0 }
 0x13c   :  { %v571_v59 = vadd.f32 %v570_v58, %v397_v57 }
 0x141   :  { %v596_v61 = vpop.f32.mrf.mxu2 }
 0x142   :  { %v597_v2 = vadd.f32 %v596_v61, %v398_v60 }
 0x143   :  { %v583_v62 = vpop.f32.mrf.mxu1  ;;  %v572_v0 = vpop.f32.mrf.mxu0 }
 0x144   :  { %v584_v63 = vadd.f32 %v583_v62, %v571_v59 }
 0x146   :  { %v613_v1 = vmax.f32 %v584_v63, 0.0 }
 0x148   :  { %v615_v3 = vpack.c.bf16 %v613_v1, %v613_v1 }
 0x149   :  { %v609_v4 = vpop.f32.mrf.mxu3  ;;  %v598_v6 = vpop.f32.mrf.mxu2 }
 0x14a   :  { %v610_v5 = vadd.f32 %v609_v4, %v597_v2  ;;  %823 = vmatmul.bf16.vlgmr.msra.gmra.mxu0 %v615_v3  ;;  %849 = vmatmul.bf16.vlgmr.msra.gmra.mxu2 %v615_v3 }
 0x14b   :  { %v585_v7 = vpop.f32.mrf.mxu1 }
 0x14c   :  { %v614_v8 = vmax.f32 %v610_v5, 0.0 }
 0x14e   :  { %v616_v9 = vpack.c.bf16 %v614_v8, %v614_v8 }
 0x150   :  { %836 = vmatmul.bf16.vlgmr.msra.gmra.mxu1 %v616_v9  ;;  %862 = vmatmul.bf16.vlgmr.msra.gmra.mxu3 %v616_v9 }
 0x151   :  { %v611_v10 = vpop.f32.mrf.mxu3 }
 0x1c7   :  { %v824_v12 = vpop.f32.mrf.mxu0 }
 0x1c8   :  { %v825_v14 = vadd.f32 %v824_v12, %v651_v13 }
 0x1cd   :  { %v837_v15 = vpop.f32.mrf.mxu1  ;;  %v850_v16 = vpop.f32.mrf.mxu2 }
 0x1ce   :  { %v838_v17 = vadd.f32 %v837_v15, %v825_v14  ;;  %v851_v20 = vadd.f32 %v850_v16, %v652_v18 }
 0x1cf   :  { %v826_v19 = vpop.f32.mrf.mxu0 }
 0x1d0   :  { %867 = vst [vmem:[#allocation11] sm:$0xff] %v838_v17 }
 0x1d3   :  { %v863_v21 = vpop.f32.mrf.mxu3 }
 0x1d4   :  { %v864_v22 = vadd.f32 %v863_v21, %v851_v20 }
 0x1d5   :  { %v839_v23 = vpop.f32.mrf.mxu1  ;;  %v852_v24 = vpop.f32.mrf.mxu2 }
 0x1d6   :  { %868 = vst [vmem:[#allocation11 + $0x8] sm:$0xff] %v864_v22 }
 0x1d7   :  { %879 = dma.vmem_to_hbm [thread:$0]  %s875_s27, 256, %s877_s30, [#allocation4]  }
 0x1db   :  { %v865_v25 = vpop.f32.mrf.mxu3 }
 0x1dc   :  { %1526 = dma.done.wait [#allocation4], 256  }
 0x1dd   :  { %1527 = vsyncadd [#allocation4], 4294967040 }
 0x1de   :  { %884 = vsyncpa [#allocation3], 1 }
 0x1df   :  { %885 = vsyncpa [#allocation6], 1 }
 0x1e0   :  { %886 = vsyncpa [#allocation9], 1 }
 0x1e1   :  { %887 = vsyncpa [#allocation4], 1 }

</bundles_post_ra>
